<compile_context>
chip_gen: v7x
topology: tpu7x:2x2x1
jax: 0.10.0
libtpu: 0.0.40
codegen_flags: <defaults>
</compile_context>

<pallas_src>
import functools
import math

import jax
import jax.numpy as jnp
import numpy as np
from jax.experimental import pallas as pl
from jax.experimental.pallas import tpu as pltpu


def _round_up(x, m):
    return (x + m - 1) // m * m


def _convex_upsample_kernel(xf_ref, w1_ref, b1_ref, w2_ref, b2_ref, out_ref,
                            taps_ref, *, wpad):
    # xf_ref  : (1, Cpad, (H+3)*Wp)  row-flattened zero-padded input
    # w1_ref  : (Chid, 9*Cpad)       3x3 conv weights, tap-major K axis
    # b1_ref  : (Chid, 1)
    # w2_ref  : (ff*16, Chid)        1x1 weights; row = sub*16 + k, 0.25 folded,
    #                                rows k in [9,16) are zero
    # b2_ref  : (ff*16, 1)           0.25 folded; rows k in [9,16) are -1e30
    # out_ref : (1, ff*Cpad, L)      L = H*Wp (multiple of 128); row = sub*Cpad + c
    # taps_ref: (9*Cpad, L)          VMEM scratch holding the 9 shifted taps
    _, fcpad, L = out_ref.shape
    cpad = taps_ref.shape[0] // 9
    ff = fcpad // cpad
    gstride = w2_ref.shape[0] // ff          # 16-row (sublane-aligned) logit groups

    # im2col: tap (dy, dx) of the padded image is a *contiguous* lane slice of
    # the row-flattened input (offset dy*Wp+dx, length H*Wp).  Materialized once,
    # reused by both matmuls and the convex combination.  Group starts k*cpad are
    # multiples of 8 (sublane-aligned).
    for k in range(9):
        dy, dx = k // 3, k % 3
        off = dy * wpad + dx
        taps_ref[k * cpad:(k + 1) * cpad, :] = xf_ref[0, :, off:off + L]
    taps = taps_ref[...]                                             # (9*Cpad, L)

    # Conv3x3 + bias + ReLU: one fused im2col matmul on the MXU
    # (operands cast to the weight dtype: f32 by default, bf16 for v6e/v7x).
    hid = jnp.maximum(
        jnp.dot(w1_ref[...], taps.astype(w1_ref.dtype),
                preferred_element_type=jnp.float32) + b1_ref[...], 0.0)   # (Chid, L)

    # All ff*16 mask logits in one matmul (0.25 pre-folded into w2/b2; the 7
    # padding rows per group carry a -1e30 bias so exp() kills them exactly).
    logits = (jnp.dot(w2_ref[...], hid.astype(w2_ref.dtype),
                      preferred_element_type=jnp.float32) + b2_ref[...])  # (ff*16, L)

    # Per sub-pixel position: softmax over the 9 real taps (16-row aligned group,
    # exact reciprocal for parity with the reference), then convex combination of
    # the 9 shifted copies; 8.0 applied once at the end.  All slice starts are
    # multiples of 8/16 -> no sublane realignment in this unrolled loop.
    for sub in range(ff):
        lg = logits[sub * gstride:(sub + 1) * gstride, :]            # (16, L)
        e = jnp.exp(lg - jnp.max(lg, axis=0, keepdims=True))
        w = e * pl.reciprocal(jnp.sum(e, axis=0, keepdims=True), approx=False)
        acc = None
        for k in range(9):
            contrib = w[k:k + 1, :] * taps[k * cpad:(k + 1) * cpad, :]
            acc = contrib if acc is None else acc + contrib
        out_ref[0, sub * cpad:(sub + 1) * cpad, :] = 8.0 * acc


def convex_upsample(x_nchw, w1, b1, w2, b2, factor=2, mxu_dtype=jnp.float32):
    """x: (B,C,H,W); w1: (2C,C,3,3), b1: (2C,), w2: (f*f*9,2C), b2: (f*f*9,)
    (PyTorch layouts).  Set mxu_dtype=jnp.bfloat16 on v6e/v7x for production C."""
    B, C, H, W = x_nchw.shape
    f = factor
    ff = f * f
    Chid = w1.shape[0]                     # 2*C
    Cpad = _round_up(C, 8)                 # sublane-aligned channel groups
    GS = 16                                # sublane-aligned logit group stride

    # Lane-dense padded width: smallest Wp >= W+2 with H*Wp % 128 == 0, so every
    # vector op and store in the kernel is full-width (no masked vst).
    step = 128 // math.gcd(H, 128)
    Wp = _round_up(W + 2, step)
    L = H * Wp                             # compute-tile lane length (mult. of 128)
    Lp = (H + 3) * Wp                      # 1 top + 2 bottom pad rows keep all taps in-bounds

    # Glue: zero-pad (channels -> Cpad, 1 top / 2 bottom, 1 left / Wp-W-1 right)
    # and row-flatten; channels on sublanes, spatial on lanes.
    xpad = jnp.pad(x_nchw.astype(jnp.float32),
                   ((0, 0), (0, Cpad - C), (1, 2), (1, Wp - W - 1)))
    xflat = xpad.reshape(B, Cpad, Lp)

    # Glue: one-time weight repack (constants folded into weights, not activations).
    # 3x3 conv: column index = k*Cpad + c with k = dy*3+dx; padded channels zeroed.
    w1_t = jnp.transpose(w1, (0, 2, 3, 1)).reshape(Chid, 9, C)
    w1_k = jnp.pad(w1_t, ((0, 0), (0, 0), (0, Cpad - C))) \
              .reshape(Chid, 9 * Cpad).astype(mxu_dtype)
    b1_k = b1.reshape(Chid, 1).astype(jnp.float32)

    # 1x1 mask conv: PyTorch channel = k*ff + sub; kernel wants row sub*GS + k with
    # 0.25 folded in.  Padding rows (k in [9,GS)) get zero weights and a -1e30 bias
    # so they drop out of the softmax exactly.
    w2_g = 0.25 * jnp.transpose(w2.reshape(9, ff, Chid), (1, 0, 2))      # (ff, 9, Chid)
    w2_k = jnp.pad(w2_g, ((0, 0), (0, GS - 9), (0, 0))) \
              .reshape(ff * GS, Chid).astype(mxu_dtype)
    b2_g = 0.25 * jnp.transpose(b2.reshape(9, ff), (1, 0))               # (ff, 9)
    b2_k = jnp.pad(b2_g, ((0, 0), (0, GS - 9)), constant_values=-1e30) \
              .reshape(ff * GS, 1).astype(jnp.float32)

    kernel = functools.partial(_convex_upsample_kernel, wpad=Wp)

    # Per-step VMEM at test shapes: double-buffered in/out blocks + (9*Cpad, L)
    # taps scratch — a few hundred KiB, well under the scoped default.
    # For production C/H/W (e.g. C=128, H=W=64) re-budget explicitly and add a
    # second "parallel" grid axis over H row-bands (overlapping index_map for the
    # 3-row halo) to keep per-step VMEM inside v7x's 64 MiB and use both cores.
    out = pl.pallas_call(
        kernel,
        out_shape=jax.ShapeDtypeStruct((B, ff * Cpad, L), jnp.float32),
        grid=(B,),
        in_specs=[
            pl.BlockSpec((1, Cpad, Lp), lambda b: (b, 0, 0)),
            pl.BlockSpec((Chid, 9 * Cpad), lambda b: (0, 0)),
            pl.BlockSpec((Chid, 1), lambda b: (0, 0)),
            pl.BlockSpec((ff * GS, Chid), lambda b: (0, 0)),
            pl.BlockSpec((ff * GS, 1), lambda b: (0, 0)),
        ],
        out_specs=pl.BlockSpec((1, ff * Cpad, L), lambda b: (b, 0, 0)),
        scratch_shapes=[pltpu.VMEM((9 * Cpad, L), jnp.float32)],
        compiler_params=pltpu.CompilerParams(dimension_semantics=("parallel",)),
    )(xflat, w1_k, b1_k, w2_k, b2_k)

    # Glue: strip pad channels/columns and pixel-shuffle to (B, C, f*H, f*W)
    # (matches up_flow.permute(0,1,4,2,5,3).reshape(...) in PyTorch).  Keeping the
    # column strip out of the kernel preserves lane-dense (128-multiple) stores.
    y = out.reshape(B, f, f, Cpad, H, Wp)[:, :, :, :C, :, :W]
    y = jnp.transpose(y, (0, 3, 4, 1, 5, 2)).reshape(B, C, f * H, f * W)
    return y


def ref_convex_upsample(x, w1, b1, w2, b2, factor=2):
    """Pure-JAX reference mirroring the PyTorch forward exactly (NCHW)."""
    B, C, H, W = x.shape
    f = factor
    h1 = jax.lax.conv_general_dilated(
        x, w1, window_strides=(1, 1), padding=((1, 1), (1, 1)),
        dimension_numbers=("NCHW", "OIHW", "NCHW")) + b1[None, :, None, None]
    h1 = jnp.maximum(h1, 0.0)
    mask = jax.lax.conv_general_dilated(
        h1, w2[:, :, None, None], window_strides=(1, 1), padding=((0, 0), (0, 0)),
        dimension_numbers=("NCHW", "OIHW", "NCHW")) + b2[None, :, None, None]
    mask = 0.25 * mask
    mask = mask.reshape(B, 1, 9, f, f, H, W)
    mask = jax.nn.softmax(mask, axis=2)
    xp = jnp.pad(8.0 * x, ((0, 0), (0, 0), (1, 1), (1, 1)))
    patches = jnp.stack(
        [xp[:, :, dy:dy + H, dx:dx + W] for dy in range(3) for dx in range(3)],
        axis=2)                                            # (B, C, 9, H, W)
    up = jnp.sum(mask * patches[:, :, :, None, None, :, :], axis=2)
    up = jnp.transpose(up, (0, 1, 4, 2, 5, 3)).reshape(B, C, f * H, f * W)
    return up


if __name__ == "__main__":
    B, C, H, W = 2, 4, 16, 16
    factor = 2
    Chid = 2 * C
    n_mask = factor * factor * 9

    key = jax.random.PRNGKey(0)
    k1, k2, k3, k4, kx = jax.random.split(key, 5)
    w1 = 0.2 * jax.random.normal(k1, (Chid, C, 3, 3), jnp.float32)
    b1 = 0.1 * jax.random.normal(k2, (Chid,), jnp.float32)
    w2 = 0.2 * jax.random.normal(k3, (n_mask, Chid), jnp.float32)
    b2 = 0.1 * jax.random.normal(k4, (n_mask,), jnp.float32)
    x = jax.random.normal(kx, (B, C, H, W), jnp.float32)

    out = jax.block_until_ready(convex_upsample(x, w1, b1, w2, b2, factor=factor))
    ref = jax.block_until_ready(ref_convex_upsample(x, w1, b1, w2, b2, factor=factor))
    assert out.shape == (B, C, factor * H, factor * W)
    # Exact softmax normalization now -> tight tolerance holds.
    np.testing.assert_allclose(np.asarray(out), np.asarray(ref), rtol=1e-3, atol=1e-3)

    print("KERNEL_OK")
</pallas_src>

<mosaic_0001>
module attributes {stable_mosaic.version = 11 : i64} {
  func.func @_convex_upsample_kernel(%arg0: i32, %arg1: memref<1x8x456xf32, #tpu.memory_space<vmem>>, %arg2: memref<8x72xf32, #tpu.memory_space<vmem>>, %arg3: memref<8x1xf32, #tpu.memory_space<vmem>>, %arg4: memref<64x8xf32, #tpu.memory_space<vmem>>, %arg5: memref<64x1xf32, #tpu.memory_space<vmem>>, %arg6: memref<1x32x384xf32, #tpu.memory_space<vmem>>, %arg7: memref<72x384xf32, #tpu.memory_space<vmem>>) attributes {dimension_semantics = [#tpu.dimension_semantics<parallel>], iteration_bounds = array<i64: 2>, scalar_prefetch = 0 : i64, scratch_operands = 1 : i64, tpu.core_type = #tpu.core_type<tc>, window_params = [{transform_indices = @transform_0, window_bounds = array<i64: 1, 8, 456>}, {pipeline_mode = #tpu.pipeline_mode<synchronous>, transform_indices = @transform_1, window_bounds = array<i64: 8, 72>}, {pipeline_mode = #tpu.pipeline_mode<synchronous>, transform_indices = @transform_2, window_bounds = array<i64: 8, 1>}, {pipeline_mode = #tpu.pipeline_mode<synchronous>, transform_indices = @transform_3, window_bounds = array<i64: 64, 8>}, {pipeline_mode = #tpu.pipeline_mode<synchronous>, transform_indices = @transform_4, window_bounds = array<i64: 64, 1>}, {transform_indices = @transform_5, window_bounds = array<i64: 1, 32, 384>}]} {
    %c0 = arith.constant 0 : index
    %c0_0 = arith.constant 0 : index
    %c0_1 = arith.constant 0 : index
    %0 = vector.load %arg1[%c0, %c0_0, %c0_1] : memref<1x8x456xf32, #tpu.memory_space<vmem>>, vector<1x8x384xf32>
    %1 = vector.shape_cast %0 : vector<1x8x384xf32> to vector<8x384xf32>
    %c0_2 = arith.constant 0 : index
    %c0_3 = arith.constant 0 : index
    %2 = vector.load %arg7[%c0_2, %c0_3] : memref<72x384xf32, #tpu.memory_space<vmem>>, vector<8x384xf32>
    tpu.vector_store %arg7[%c0_2, %c0_3], %1 {strides = array<i32>} : memref<72x384xf32, #tpu.memory_space<vmem>>, vector<8x384xf32>,
    %c0_4 = arith.constant 0 : index
    %c0_5 = arith.constant 0 : index
    %c1 = arith.constant 1 : index
    %3 = vector.load %arg1[%c0_4, %c0_5, %c1] : memref<1x8x456xf32, #tpu.memory_space<vmem>>, vector<1x8x384xf32>
    %4 = vector.shape_cast %3 : vector<1x8x384xf32> to vector<8x384xf32>
    %c8 = arith.constant 8 : index
    %c0_6 = arith.constant 0 : index
    %5 = vector.load %arg7[%c8, %c0_6] : memref<72x384xf32, #tpu.memory_space<vmem>>, vector<8x384xf32>
    tpu.vector_store %arg7[%c8, %c0_6], %4 {strides = array<i32>} : memref<72x384xf32, #tpu.memory_space<vmem>>, vector<8x384xf32>,
    %c0_7 = arith.constant 0 : index
    %c0_8 = arith.constant 0 : index
    %c2 = arith.constant 2 : index
    %6 = vector.load %arg1[%c0_7, %c0_8, %c2] : memref<1x8x456xf32, #tpu.memory_space<vmem>>, vector<1x8x384xf32>
    %7 = vector.shape_cast %6 : vector<1x8x384xf32> to vector<8x384xf32>
    %c16 = arith.constant 16 : index
    %c0_9 = arith.constant 0 : index
    %8 = vector.load %arg7[%c16, %c0_9] : memref<72x384xf32, #tpu.memory_space<vmem>>, vector<8x384xf32>
    tpu.vector_store %arg7[%c16, %c0_9], %7 {strides = array<i32>} : memref<72x384xf32, #tpu.memory_space<vmem>>, vector<8x384xf32>,
    %c0_10 = arith.constant 0 : index
    %c0_11 = arith.constant 0 : index
    %c24 = arith.constant 24 : index
    %9 = vector.load %arg1[%c0_10, %c0_11, %c24] : memref<1x8x456xf32, #tpu.memory_space<vmem>>, vector<1x8x384xf32>
    %10 = vector.shape_cast %9 : vector<1x8x384xf32> to vector<8x384xf32>
    %c24_12 = arith.constant 24 : index
    %c0_13 = arith.constant 0 : index
    %11 = vector.load %arg7[%c24_12, %c0_13] : memref<72x384xf32, #tpu.memory_space<vmem>>, vector<8x384xf32>
    tpu.vector_store %arg7[%c24_12, %c0_13], %10 {strides = array<i32>} : memref<72x384xf32, #tpu.memory_space<vmem>>, vector<8x384xf32>,
    %c0_14 = arith.constant 0 : index
    %c0_15 = arith.constant 0 : index
    %c25 = arith.constant 25 : index
    %12 = vector.load %arg1[%c0_14, %c0_15, %c25] : memref<1x8x456xf32, #tpu.memory_space<vmem>>, vector<1x8x384xf32>
    %13 = vector.shape_cast %12 : vector<1x8x384xf32> to vector<8x384xf32>
    %c32 = arith.constant 32 : index
    %c0_16 = arith.constant 0 : index
    %14 = vector.load %arg7[%c32, %c0_16] : memref<72x384xf32, #tpu.memory_space<vmem>>, vector<8x384xf32>
    tpu.vector_store %arg7[%c32, %c0_16], %13 {strides = array<i32>} : memref<72x384xf32, #tpu.memory_space<vmem>>, vector<8x384xf32>,
    %c0_17 = arith.constant 0 : index
    %c0_18 = arith.constant 0 : index
    %c26 = arith.constant 26 : index
    %15 = vector.load %arg1[%c0_17, %c0_18, %c26] : memref<1x8x456xf32, #tpu.memory_space<vmem>>, vector<1x8x384xf32>
    %16 = vector.shape_cast %15 : vector<1x8x384xf32> to vector<8x384xf32>
    %c40 = arith.constant 40 : index
    %c0_19 = arith.constant 0 : index
    %17 = vector.load %arg7[%c40, %c0_19] : memref<72x384xf32, #tpu.memory_space<vmem>>, vector<8x384xf32>
    tpu.vector_store %arg7[%c40, %c0_19], %16 {strides = array<i32>} : memref<72x384xf32, #tpu.memory_space<vmem>>, vector<8x384xf32>,
    %c0_20 = arith.constant 0 : index
    %c0_21 = arith.constant 0 : index
    %c48 = arith.constant 48 : index
    %18 = vector.load %arg1[%c0_20, %c0_21, %c48] : memref<1x8x456xf32, #tpu.memory_space<vmem>>, vector<1x8x384xf32>
    %19 = vector.shape_cast %18 : vector<1x8x384xf32> to vector<8x384xf32>
    %c48_22 = arith.constant 48 : index
    %c0_23 = arith.constant 0 : index
    %20 = vector.load %arg7[%c48_22, %c0_23] : memref<72x384xf32, #tpu.memory_space<vmem>>, vector<8x384xf32>
    tpu.vector_store %arg7[%c48_22, %c0_23], %19 {strides = array<i32>} : memref<72x384xf32, #tpu.memory_space<vmem>>, vector<8x384xf32>,
    %c0_24 = arith.constant 0 : index
    %c0_25 = arith.constant 0 : index
    %c49 = arith.constant 49 : index
    %21 = vector.load %arg1[%c0_24, %c0_25, %c49] : memref<1x8x456xf32, #tpu.memory_space<vmem>>, vector<1x8x384xf32>
    %22 = vector.shape_cast %21 : vector<1x8x384xf32> to vector<8x384xf32>
    %c56 = arith.constant 56 : index
    %c0_26 = arith.constant 0 : index
    %23 = vector.load %arg7[%c56, %c0_26] : memref<72x384xf32, #tpu.memory_space<vmem>>, vector<8x384xf32>
    tpu.vector_store %arg7[%c56, %c0_26], %22 {strides = array<i32>} : memref<72x384xf32, #tpu.memory_space<vmem>>, vector<8x384xf32>,
    %c0_27 = arith.constant 0 : index
    %c0_28 = arith.constant 0 : index
    %c50 = arith.constant 50 : index
    %24 = vector.load %arg1[%c0_27, %c0_28, %c50] : memref<1x8x456xf32, #tpu.memory_space<vmem>>, vector<1x8x384xf32>
    %25 = vector.shape_cast %24 : vector<1x8x384xf32> to vector<8x384xf32>
    %c64 = arith.constant 64 : index
    %c0_29 = arith.constant 0 : index
    %26 = vector.load %arg7[%c64, %c0_29] : memref<72x384xf32, #tpu.memory_space<vmem>>, vector<8x384xf32>
    tpu.vector_store %arg7[%c64, %c0_29], %25 {strides = array<i32>} : memref<72x384xf32, #tpu.memory_space<vmem>>, vector<8x384xf32>,
    %c0_30 = arith.constant 0 : index
    %c0_31 = arith.constant 0 : index
    %27 = vector.load %arg7[%c0_30, %c0_31] : memref<72x384xf32, #tpu.memory_space<vmem>>, vector<72x384xf32>
    %c0_32 = arith.constant 0 : index
    %c0_33 = arith.constant 0 : index
    %28 = vector.load %arg2[%c0_32, %c0_33] : memref<8x72xf32, #tpu.memory_space<vmem>>, vector<8x72xf32>
    %cst = arith.constant dense<0.000000e+00> : vector<8x384xf32>
    %29 = tpu.matmul %28, %27, %cst {dimension_numbers = #tpu.dot_dimension_numbers<[1], [0], [0], [1], [0, 0, 1, 1], [], []>} : vector<8x72xf32>, vector<72x384xf32>, vector<8x384xf32> -> vector<8x384xf32>
    %c0_34 = arith.constant 0 : index
    %c0_35 = arith.constant 0 : index
    %30 = vector.load %arg3[%c0_34, %c0_35] : memref<8x1xf32, #tpu.memory_space<vmem>>, vector<8x1xf32>
    %31 = vector.broadcast %30 : vector<8x1xf32> to vector<8x384xf32>
    %32 = arith.addf %29, %31 : vector<8x384xf32>
    %cst_36 = arith.constant 0.000000e+00 : f32
    %33 = vector.broadcast %cst_36 : f32 to vector<8x384xf32>
    %34 = arith.maximumf %32, %33 : vector<8x384xf32>
    %c0_37 = arith.constant 0 : index
    %c0_38 = arith.constant 0 : index
    %35 = vector.load %arg4[%c0_37, %c0_38] : memref<64x8xf32, #tpu.memory_space<vmem>>, vector<64x8xf32>
    %cst_39 = arith.constant dense<0.000000e+00> : vector<64x384xf32>
    %36 = tpu.matmul %35, %34, %cst_39 {dimension_numbers = #tpu.dot_dimension_numbers<[1], [0], [0], [1], [0, 0, 1, 1], [], []>} : vector<64x8xf32>, vector<8x384xf32>, vector<64x384xf32> -> vector<64x384xf32>
    %c0_40 = arith.constant 0 : index
    %c0_41 = arith.constant 0 : index
    %37 = vector.load %arg5[%c0_40, %c0_41] : memref<64x1xf32, #tpu.memory_space<vmem>>, vector<64x1xf32>
    %38 = vector.broadcast %37 : vector<64x1xf32> to vector<64x384xf32>
    %39 = arith.addf %36, %38 : vector<64x384xf32>
    %40 = vector.extract_strided_slice %39 {offsets = [0, 0], sizes = [16, 384], strides = [1, 1]} : vector<64x384xf32> to vector<16x384xf32>
    %cst_42 = arith.constant dense<0xFF800000> : vector<384xf32>
    %41 = vector.multi_reduction <maximumf>, %40, %cst_42 [0] : vector<16x384xf32> to vector<384xf32>
    %42 = vector.shape_cast %41 : vector<384xf32> to vector<1x384xf32>
    %43 = vector.broadcast %42 : vector<1x384xf32> to vector<16x384xf32>
    %44 = arith.subf %40, %43 : vector<16x384xf32>
    %45 = math.exp %44 : vector<16x384xf32>
    %cst_43 = arith.constant dense<0.000000e+00> : vector<384xf32>
    %46 = vector.multi_reduction <add>, %45, %cst_43 [0] : vector<16x384xf32> to vector<384xf32>
    %47 = vector.shape_cast %46 : vector<384xf32> to vector<1x384xf32>
    %48 = tpu.reciprocal %47 : vector<1x384xf32> -> vector<1x384xf32>
    %49 = vector.broadcast %48 : vector<1x384xf32> to vector<16x384xf32>
    %50 = arith.mulf %45, %49 : vector<16x384xf32>
    %51 = vector.extract_strided_slice %50 {offsets = [0, 0], sizes = [1, 384], strides = [1, 1]} : vector<16x384xf32> to vector<1x384xf32>
    %52 = vector.extract_strided_slice %27 {offsets = [0, 0], sizes = [8, 384], strides = [1, 1]} : vector<72x384xf32> to vector<8x384xf32>
    %53 = vector.broadcast %51 : vector<1x384xf32> to vector<8x384xf32>
    %54 = arith.mulf %53, %52 : vector<8x384xf32>
    %55 = vector.extract_strided_slice %50 {offsets = [1, 0], sizes = [1, 384], strides = [1, 1]} : vector<16x384xf32> to vector<1x384xf32>
    %56 = vector.extract_strided_slice %27 {offsets = [8, 0], sizes = [8, 384], strides = [1, 1]} : vector<72x384xf32> to vector<8x384xf32>
    %57 = vector.broadcast %55 : vector<1x384xf32> to vector<8x384xf32>
    %58 = arith.mulf %57, %56 : vector<8x384xf32>
    %59 = arith.addf %54, %58 : vector<8x384xf32>
    %60 = vector.extract_strided_slice %50 {offsets = [2, 0], sizes = [1, 384], strides = [1, 1]} : vector<16x384xf32> to vector<1x384xf32>
    %61 = vector.extract_strided_slice %27 {offsets = [16, 0], sizes = [8, 384], strides = [1, 1]} : vector<72x384xf32> to vector<8x384xf32>
    %62 = vector.broadcast %60 : vector<1x384xf32> to vector<8x384xf32>
    %63 = arith.mulf %62, %61 : vector<8x384xf32>
    %64 = arith.addf %59, %63 : vector<8x384xf32>
    %65 = vector.extract_strided_slice %50 {offsets = [3, 0], sizes = [1, 384], strides = [1, 1]} : vector<16x384xf32> to vector<1x384xf32>
    %66 = vector.extract_strided_slice %27 {offsets = [24, 0], sizes = [8, 384], strides = [1, 1]} : vector<72x384xf32> to vector<8x384xf32>
    %67 = vector.broadcast %65 : vector<1x384xf32> to vector<8x384xf32>
    %68 = arith.mulf %67, %66 : vector<8x384xf32>
    %69 = arith.addf %64, %68 : vector<8x384xf32>
    %70 = vector.extract_strided_slice %50 {offsets = [4, 0], sizes = [1, 384], strides = [1, 1]} : vector<16x384xf32> to vector<1x384xf32>
    %71 = vector.extract_strided_slice %27 {offsets = [32, 0], sizes = [8, 384], strides = [1, 1]} : vector<72x384xf32> to vector<8x384xf32>
    %72 = vector.broadcast %70 : vector<1x384xf32> to vector<8x384xf32>
    %73 = arith.mulf %72, %71 : vector<8x384xf32>
    %74 = arith.addf %69, %73 : vector<8x384xf32>
    %75 = vector.extract_strided_slice %50 {offsets = [5, 0], sizes = [1, 384], strides = [1, 1]} : vector<16x384xf32> to vector<1x384xf32>
    %76 = vector.extract_strided_slice %27 {offsets = [40, 0], sizes = [8, 384], strides = [1, 1]} : vector<72x384xf32> to vector<8x384xf32>
    %77 = vector.broadcast %75 : vector<1x384xf32> to vector<8x384xf32>
    %78 = arith.mulf %77, %76 : vector<8x384xf32>
    %79 = arith.addf %74, %78 : vector<8x384xf32>
    %80 = vector.extract_strided_slice %50 {offsets = [6, 0], sizes = [1, 384], strides = [1, 1]} : vector<16x384xf32> to vector<1x384xf32>
    %81 = vector.extract_strided_slice %27 {offsets = [48, 0], sizes = [8, 384], strides = [1, 1]} : vector<72x384xf32> to vector<8x384xf32>
    %82 = vector.broadcast %80 : vector<1x384xf32> to vector<8x384xf32>
    %83 = arith.mulf %82, %81 : vector<8x384xf32>
    %84 = arith.addf %79, %83 : vector<8x384xf32>
    %85 = vector.extract_strided_slice %50 {offsets = [7, 0], sizes = [1, 384], strides = [1, 1]} : vector<16x384xf32> to vector<1x384xf32>
    %86 = vector.extract_strided_slice %27 {offsets = [56, 0], sizes = [8, 384], strides = [1, 1]} : vector<72x384xf32> to vector<8x384xf32>
    %87 = vector.broadcast %85 : vector<1x384xf32> to vector<8x384xf32>
    %88 = arith.mulf %87, %86 : vector<8x384xf32>
    %89 = arith.addf %84, %88 : vector<8x384xf32>
    %90 = vector.extract_strided_slice %50 {offsets = [8, 0], sizes = [1, 384], strides = [1, 1]} : vector<16x384xf32> to vector<1x384xf32>
    %91 = vector.extract_strided_slice %27 {offsets = [64, 0], sizes = [8, 384], strides = [1, 1]} : vector<72x384xf32> to vector<8x384xf32>
    %92 = vector.broadcast %90 : vector<1x384xf32> to vector<8x384xf32>
    %93 = arith.mulf %92, %91 : vector<8x384xf32>
    %94 = arith.addf %89, %93 : vector<8x384xf32>
    %cst_44 = arith.constant 8.000000e+00 : f32
    %95 = vector.broadcast %cst_44 : f32 to vector<8x384xf32>
    %96 = arith.mulf %95, %94 : vector<8x384xf32>
    %c0_45 = arith.constant 0 : index
    %c0_46 = arith.constant 0 : index
    %c0_47 = arith.constant 0 : index
    %97 = vector.load %arg6[%c0_45, %c0_46, %c0_47] : memref<1x32x384xf32, #tpu.memory_space<vmem>>, vector<1x8x384xf32>
    %98 = vector.shape_cast %97 : vector<1x8x384xf32> to vector<8x384xf32>
    %99 = vector.shape_cast %96 : vector<8x384xf32> to vector<1x8x384xf32>
    tpu.vector_store %arg6[%c0_45, %c0_46, %c0_47], %99 {strides = array<i32>} : memref<1x32x384xf32, #tpu.memory_space<vmem>>, vector<1x8x384xf32>,
    %100 = vector.extract_strided_slice %39 {offsets = [16, 0], sizes = [16, 384], strides = [1, 1]} : vector<64x384xf32> to vector<16x384xf32>
    %cst_48 = arith.constant dense<0xFF800000> : vector<384xf32>
    %101 = vector.multi_reduction <maximumf>, %100, %cst_48 [0] : vector<16x384xf32> to vector<384xf32>
    %102 = vector.shape_cast %101 : vector<384xf32> to vector<1x384xf32>
    %103 = vector.broadcast %102 : vector<1x384xf32> to vector<16x384xf32>
    %104 = arith.subf %100, %103 : vector<16x384xf32>
    %105 = math.exp %104 : vector<16x384xf32>
    %cst_49 = arith.constant dense<0.000000e+00> : vector<384xf32>
    %106 = vector.multi_reduction <add>, %105, %cst_49 [0] : vector<16x384xf32> to vector<384xf32>
    %107 = vector.shape_cast %106 : vector<384xf32> to vector<1x384xf32>
    %108 = tpu.reciprocal %107 : vector<1x384xf32> -> vector<1x384xf32>
    %109 = vector.broadcast %108 : vector<1x384xf32> to vector<16x384xf32>
    %110 = arith.mulf %105, %109 : vector<16x384xf32>
    %111 = vector.extract_strided_slice %110 {offsets = [0, 0], sizes = [1, 384], strides = [1, 1]} : vector<16x384xf32> to vector<1x384xf32>
    %112 = vector.extract_strided_slice %27 {offsets = [0, 0], sizes = [8, 384], strides = [1, 1]} : vector<72x384xf32> to vector<8x384xf32>
    %113 = vector.broadcast %111 : vector<1x384xf32> to vector<8x384xf32>
    %114 = arith.mulf %113, %112 : vector<8x384xf32>
    %115 = vector.extract_strided_slice %110 {offsets = [1, 0], sizes = [1, 384], strides = [1, 1]} : vector<16x384xf32> to vector<1x384xf32>
    %116 = vector.extract_strided_slice %27 {offsets = [8, 0], sizes = [8, 384], strides = [1, 1]} : vector<72x384xf32> to vector<8x384xf32>
    %117 = vector.broadcast %115 : vector<1x384xf32> to vector<8x384xf32>
    %118 = arith.mulf %117, %116 : vector<8x384xf32>
    %119 = arith.addf %114, %118 : vector<8x384xf32>
    %120 = vector.extract_strided_slice %110 {offsets = [2, 0], sizes = [1, 384], strides = [1, 1]} : vector<16x384xf32> to vector<1x384xf32>
    %121 = vector.extract_strided_slice %27 {offsets = [16, 0], sizes = [8, 384], strides = [1, 1]} : vector<72x384xf32> to vector<8x384xf32>
    %122 = vector.broadcast %120 : vector<1x384xf32> to vector<8x384xf32>
    %123 = arith.mulf %122, %121 : vector<8x384xf32>
    %124 = arith.addf %119, %123 : vector<8x384xf32>
    %125 = vector.extract_strided_slice %110 {offsets = [3, 0], sizes = [1, 384], strides = [1, 1]} : vector<16x384xf32> to vector<1x384xf32>
    %126 = vector.extract_strided_slice %27 {offsets = [24, 0], sizes = [8, 384], strides = [1, 1]} : vector<72x384xf32> to vector<8x384xf32>
    %127 = vector.broadcast %125 : vector<1x384xf32> to vector<8x384xf32>
    %128 = arith.mulf %127, %126 : vector<8x384xf32>
    %129 = arith.addf %124, %128 : vector<8x384xf32>
    %130 = vector.extract_strided_slice %110 {offsets = [4, 0], sizes = [1, 384], strides = [1, 1]} : vector<16x384xf32> to vector<1x384xf32>
    %131 = vector.extract_strided_slice %27 {offsets = [32, 0], sizes = [8, 384], strides = [1, 1]} : vector<72x384xf32> to vector<8x384xf32>
    %132 = vector.broadcast %130 : vector<1x384xf32> to vector<8x384xf32>
    %133 = arith.mulf %132, %131 : vector<8x384xf32>
    %134 = arith.addf %129, %133 : vector<8x384xf32>
    %135 = vector.extract_strided_slice %110 {offsets = [5, 0], sizes = [1, 384], strides = [1, 1]} : vector<16x384xf32> to vector<1x384xf32>
    %136 = vector.extract_strided_slice %27 {offsets = [40, 0], sizes = [8, 384], strides = [1, 1]} : vector<72x384xf32> to vector<8x384xf32>
    %137 = vector.broadcast %135 : vector<1x384xf32> to vector<8x384xf32>
    %138 = arith.mulf %137, %136 : vector<8x384xf32>
    %139 = arith.addf %134, %138 : vector<8x384xf32>
    %140 = vector.extract_strided_slice %110 {offsets = [6, 0], sizes = [1, 384], strides = [1, 1]} : vector<16x384xf32> to vector<1x384xf32>
    %141 = vector.extract_strided_slice %27 {offsets = [48, 0], sizes = [8, 384], strides = [1, 1]} : vector<72x384xf32> to vector<8x384xf32>
    %142 = vector.broadcast %140 : vector<1x384xf32> to vector<8x384xf32>
    %143 = arith.mulf %142, %141 : vector<8x384xf32>
    %144 = arith.addf %139, %143 : vector<8x384xf32>
    %145 = vector.extract_strided_slice %110 {offsets = [7, 0], sizes = [1, 384], strides = [1, 1]} : vector<16x384xf32> to vector<1x384xf32>
    %146 = vector.extract_strided_slice %27 {offsets = [56, 0], sizes = [8, 384], strides = [1, 1]} : vector<72x384xf32> to vector<8x384xf32>
    %147 = vector.broadcast %145 : vector<1x384xf32> to vector<8x384xf32>
    %148 = arith.mulf %147, %146 : vector<8x384xf32>
    %149 = arith.addf %144, %148 : vector<8x384xf32>
    %150 = vector.extract_strided_slice %110 {offsets = [8, 0], sizes = [1, 384], strides = [1, 1]} : vector<16x384xf32> to vector<1x384xf32>
    %151 = vector.extract_strided_slice %27 {offsets = [64, 0], sizes = [8, 384], strides = [1, 1]} : vector<72x384xf32> to vector<8x384xf32>
    %152 = vector.broadcast %150 : vector<1x384xf32> to vector<8x384xf32>
    %153 = arith.mulf %152, %151 : vector<8x384xf32>
    %154 = arith.addf %149, %153 : vector<8x384xf32>
    %cst_50 = arith.constant 8.000000e+00 : f32
    %155 = vector.broadcast %cst_50 : f32 to vector<8x384xf32>
    %156 = arith.mulf %155, %154 : vector<8x384xf32>
    %c0_51 = arith.constant 0 : index
    %c8_52 = arith.constant 8 : index
    %c0_53 = arith.constant 0 : index
    %157 = vector.load %arg6[%c0_51, %c8_52, %c0_53] : memref<1x32x384xf32, #tpu.memory_space<vmem>>, vector<1x8x384xf32>
    %158 = vector.shape_cast %157 : vector<1x8x384xf32> to vector<8x384xf32>
    %159 = vector.shape_cast %156 : vector<8x384xf32> to vector<1x8x384xf32>
    tpu.vector_store %arg6[%c0_51, %c8_52, %c0_53], %159 {strides = array<i32>} : memref<1x32x384xf32, #tpu.memory_space<vmem>>, vector<1x8x384xf32>,
    %160 = vector.extract_strided_slice %39 {offsets = [32, 0], sizes = [16, 384], strides = [1, 1]} : vector<64x384xf32> to vector<16x384xf32>
    %cst_54 = arith.constant dense<0xFF800000> : vector<384xf32>
    %161 = vector.multi_reduction <maximumf>, %160, %cst_54 [0] : vector<16x384xf32> to vector<384xf32>
    %162 = vector.shape_cast %161 : vector<384xf32> to vector<1x384xf32>
    %163 = vector.broadcast %162 : vector<1x384xf32> to vector<16x384xf32>
    %164 = arith.subf %160, %163 : vector<16x384xf32>
    %165 = math.exp %164 : vector<16x384xf32>
    %cst_55 = arith.constant dense<0.000000e+00> : vector<384xf32>
    %166 = vector.multi_reduction <add>, %165, %cst_55 [0] : vector<16x384xf32> to vector<384xf32>
    %167 = vector.shape_cast %166 : vector<384xf32> to vector<1x384xf32>
    %168 = tpu.reciprocal %167 : vector<1x384xf32> -> vector<1x384xf32>
    %169 = vector.broadcast %168 : vector<1x384xf32> to vector<16x384xf32>
    %170 = arith.mulf %165, %169 : vector<16x384xf32>
    %171 = vector.extract_strided_slice %170 {offsets = [0, 0], sizes = [1, 384], strides = [1, 1]} : vector<16x384xf32> to vector<1x384xf32>
    %172 = vector.extract_strided_slice %27 {offsets = [0, 0], sizes = [8, 384], strides = [1, 1]} : vector<72x384xf32> to vector<8x384xf32>
    %173 = vector.broadcast %171 : vector<1x384xf32> to vector<8x384xf32>
    %174 = arith.mulf %173, %172 : vector<8x384xf32>
    %175 = vector.extract_strided_slice %170 {offsets = [1, 0], sizes = [1, 384], strides = [1, 1]} : vector<16x384xf32> to vector<1x384xf32>
    %176 = vector.extract_strided_slice %27 {offsets = [8, 0], sizes = [8, 384], strides = [1, 1]} : vector<72x384xf32> to vector<8x384xf32>
    %177 = vector.broadcast %175 : vector<1x384xf32> to vector<8x384xf32>
    %178 = arith.mulf %177, %176 : vector<8x384xf32>
    %179 = arith.addf %174, %178 : vector<8x384xf32>
    %180 = vector.extract_strided_slice %170 {offsets = [2, 0], sizes = [1, 384], strides = [1, 1]} : vector<16x384xf32> to vector<1x384xf32>
    %181 = vector.extract_strided_slice %27 {offsets = [16, 0], sizes = [8, 384], strides = [1, 1]} : vector<72x384xf32> to vector<8x384xf32>
    %182 = vector.broadcast %180 : vector<1x384xf32> to vector<8x384xf32>
    %183 = arith.mulf %182, %181 : vector<8x384xf32>
    %184 = arith.addf %179, %183 : vector<8x384xf32>
    %185 = vector.extract_strided_slice %170 {offsets = [3, 0], sizes = [1, 384], strides = [1, 1]} : vector<16x384xf32> to vector<1x384xf32>
    %186 = vector.extract_strided_slice %27 {offsets = [24, 0], sizes = [8, 384], strides = [1, 1]} : vector<72x384xf32> to vector<8x384xf32>
    %187 = vector.broadcast %185 : vector<1x384xf32> to vector<8x384xf32>
    %188 = arith.mulf %187, %186 : vector<8x384xf32>
    %189 = arith.addf %184, %188 : vector<8x384xf32>
    %190 = vector.extract_strided_slice %170 {offsets = [4, 0], sizes = [1, 384], strides = [1, 1]} : vector<16x384xf32> to vector<1x384xf32>
    %191 = vector.extract_strided_slice %27 {offsets = [32, 0], sizes = [8, 384], strides = [1, 1]} : vector<72x384xf32> to vector<8x384xf32>
    %192 = vector.broadcast %190 : vector<1x384xf32> to vector<8x384xf32>
    %193 = arith.mulf %192, %191 : vector<8x384xf32>
    %194 = arith.addf %189, %193 : vector<8x384xf32>
    %195 = vector.extract_strided_slice %170 {offsets = [5, 0], sizes = [1, 384], strides = [1, 1]} : vector<16x384xf32> to vector<1x384xf32>
    %196 = vector.extract_strided_slice %27 {offsets = [40, 0], sizes = [8, 384], strides = [1, 1]} : vector<72x384xf32> to vector<8x384xf32>
    %197 = vector.broadcast %195 : vector<1x384xf32> to vector<8x384xf32>
    %198 = arith.mulf %197, %196 : vector<8x384xf32>
    %199 = arith.addf %194, %198 : vector<8x384xf32>
    %200 = vector.extract_strided_slice %170 {offsets = [6, 0], sizes = [1, 384], strides = [1, 1]} : vector<16x384xf32> to vector<1x384xf32>
    %201 = vector.extract_strided_slice %27 {offsets = [48, 0], sizes = [8, 384], strides = [1, 1]} : vector<72x384xf32> to vector<8x384xf32>
    %202 = vector.broadcast %200 : vector<1x384xf32> to vector<8x384xf32>
    %203 = arith.mulf %202, %201 : vector<8x384xf32>
    %204 = arith.addf %199, %203 : vector<8x384xf32>
    %205 = vector.extract_strided_slice %170 {offsets = [7, 0], sizes = [1, 384], strides = [1, 1]} : vector<16x384xf32> to vector<1x384xf32>
    %206 = vector.extract_strided_slice %27 {offsets = [56, 0], sizes = [8, 384], strides = [1, 1]} : vector<72x384xf32> to vector<8x384xf32>
    %207 = vector.broadcast %205 : vector<1x384xf32> to vector<8x384xf32>
    %208 = arith.mulf %207, %206 : vector<8x384xf32>
    %209 = arith.addf %204, %208 : vector<8x384xf32>
    %210 = vector.extract_strided_slice %170 {offsets = [8, 0], sizes = [1, 384], strides = [1, 1]} : vector<16x384xf32> to vector<1x384xf32>
    %211 = vector.extract_strided_slice %27 {offsets = [64, 0], sizes = [8, 384], strides = [1, 1]} : vector<72x384xf32> to vector<8x384xf32>
    %212 = vector.broadcast %210 : vector<1x384xf32> to vector<8x384xf32>
    %213 = arith.mulf %212, %211 : vector<8x384xf32>
    %214 = arith.addf %209, %213 : vector<8x384xf32>
    %cst_56 = arith.constant 8.000000e+00 : f32
    %215 = vector.broadcast %cst_56 : f32 to vector<8x384xf32>
    %216 = arith.mulf %215, %214 : vector<8x384xf32>
    %c0_57 = arith.constant 0 : index
    %c16_58 = arith.constant 16 : index
    %c0_59 = arith.constant 0 : index
    %217 = vector.load %arg6[%c0_57, %c16_58, %c0_59] : memref<1x32x384xf32, #tpu.memory_space<vmem>>, vector<1x8x384xf32>
    %218 = vector.shape_cast %217 : vector<1x8x384xf32> to vector<8x384xf32>
    %219 = vector.shape_cast %216 : vector<8x384xf32> to vector<1x8x384xf32>
    tpu.vector_store %arg6[%c0_57, %c16_58, %c0_59], %219 {strides = array<i32>} : memref<1x32x384xf32, #tpu.memory_space<vmem>>, vector<1x8x384xf32>,
    %220 = vector.extract_strided_slice %39 {offsets = [48, 0], sizes = [16, 384], strides = [1, 1]} : vector<64x384xf32> to vector<16x384xf32>
    %cst_60 = arith.constant dense<0xFF800000> : vector<384xf32>
    %221 = vector.multi_reduction <maximumf>, %220, %cst_60 [0] : vector<16x384xf32> to vector<384xf32>
    %222 = vector.shape_cast %221 : vector<384xf32> to vector<1x384xf32>
    %223 = vector.broadcast %222 : vector<1x384xf32> to vector<16x384xf32>
    %224 = arith.subf %220, %223 : vector<16x384xf32>
    %225 = math.exp %224 : vector<16x384xf32>
    %cst_61 = arith.constant dense<0.000000e+00> : vector<384xf32>
    %226 = vector.multi_reduction <add>, %225, %cst_61 [0] : vector<16x384xf32> to vector<384xf32>
    %227 = vector.shape_cast %226 : vector<384xf32> to vector<1x384xf32>
    %228 = tpu.reciprocal %227 : vector<1x384xf32> -> vector<1x384xf32>
    %229 = vector.broadcast %228 : vector<1x384xf32> to vector<16x384xf32>
    %230 = arith.mulf %225, %229 : vector<16x384xf32>
    %231 = vector.extract_strided_slice %230 {offsets = [0, 0], sizes = [1, 384], strides = [1, 1]} : vector<16x384xf32> to vector<1x384xf32>
    %232 = vector.extract_strided_slice %27 {offsets = [0, 0], sizes = [8, 384], strides = [1, 1]} : vector<72x384xf32> to vector<8x384xf32>
    %233 = vector.broadcast %231 : vector<1x384xf32> to vector<8x384xf32>
    %234 = arith.mulf %233, %232 : vector<8x384xf32>
    %235 = vector.extract_strided_slice %230 {offsets = [1, 0], sizes = [1, 384], strides = [1, 1]} : vector<16x384xf32> to vector<1x384xf32>
    %236 = vector.extract_strided_slice %27 {offsets = [8, 0], sizes = [8, 384], strides = [1, 1]} : vector<72x384xf32> to vector<8x384xf32>
    %237 = vector.broadcast %235 : vector<1x384xf32> to vector<8x384xf32>
    %238 = arith.mulf %237, %236 : vector<8x384xf32>
    %239 = arith.addf %234, %238 : vector<8x384xf32>
    %240 = vector.extract_strided_slice %230 {offsets = [2, 0], sizes = [1, 384], strides = [1, 1]} : vector<16x384xf32> to vector<1x384xf32>
    %241 = vector.extract_strided_slice %27 {offsets = [16, 0], sizes = [8, 384], strides = [1, 1]} : vector<72x384xf32> to vector<8x384xf32>
    %242 = vector.broadcast %240 : vector<1x384xf32> to vector<8x384xf32>
    %243 = arith.mulf %242, %241 : vector<8x384xf32>
    %244 = arith.addf %239, %243 : vector<8x384xf32>
    %245 = vector.extract_strided_slice %230 {offsets = [3, 0], sizes = [1, 384], strides = [1, 1]} : vector<16x384xf32> to vector<1x384xf32>
    %246 = vector.extract_strided_slice %27 {offsets = [24, 0], sizes = [8, 384], strides = [1, 1]} : vector<72x384xf32> to vector<8x384xf32>
    %247 = vector.broadcast %245 : vector<1x384xf32> to vector<8x384xf32>
    %248 = arith.mulf %247, %246 : vector<8x384xf32>
    %249 = arith.addf %244, %248 : vector<8x384xf32>
    %250 = vector.extract_strided_slice %230 {offsets = [4, 0], sizes = [1, 384], strides = [1, 1]} : vector<16x384xf32> to vector<1x384xf32>
    %251 = vector.extract_strided_slice %27 {offsets = [32, 0], sizes = [8, 384], strides = [1, 1]} : vector<72x384xf32> to vector<8x384xf32>
    %252 = vector.broadcast %250 : vector<1x384xf32> to vector<8x384xf32>
    %253 = arith.mulf %252, %251 : vector<8x384xf32>
    %254 = arith.addf %249, %253 : vector<8x384xf32>
    %255 = vector.extract_strided_slice %230 {offsets = [5, 0], sizes = [1, 384], strides = [1, 1]} : vector<16x384xf32> to vector<1x384xf32>
    %256 = vector.extract_strided_slice %27 {offsets = [40, 0], sizes = [8, 384], strides = [1, 1]} : vector<72x384xf32> to vector<8x384xf32>
    %257 = vector.broadcast %255 : vector<1x384xf32> to vector<8x384xf32>
    %258 = arith.mulf %257, %256 : vector<8x384xf32>
    %259 = arith.addf %254, %258 : vector<8x384xf32>
    %260 = vector.extract_strided_slice %230 {offsets = [6, 0], sizes = [1, 384], strides = [1, 1]} : vector<16x384xf32> to vector<1x384xf32>
    %261 = vector.extract_strided_slice %27 {offsets = [48, 0], sizes = [8, 384], strides = [1, 1]} : vector<72x384xf32> to vector<8x384xf32>
    %262 = vector.broadcast %260 : vector<1x384xf32> to vector<8x384xf32>
    %263 = arith.mulf %262, %261 : vector<8x384xf32>
    %264 = arith.addf %259, %263 : vector<8x384xf32>
    %265 = vector.extract_strided_slice %230 {offsets = [7, 0], sizes = [1, 384], strides = [1, 1]} : vector<16x384xf32> to vector<1x384xf32>
    %266 = vector.extract_strided_slice %27 {offsets = [56, 0], sizes = [8, 384], strides = [1, 1]} : vector<72x384xf32> to vector<8x384xf32>
    %267 = vector.broadcast %265 : vector<1x384xf32> to vector<8x384xf32>
    %268 = arith.mulf %267, %266 : vector<8x384xf32>
    %269 = arith.addf %264, %268 : vector<8x384xf32>
    %270 = vector.extract_strided_slice %230 {offsets = [8, 0], sizes = [1, 384], strides = [1, 1]} : vector<16x384xf32> to vector<1x384xf32>
    %271 = vector.extract_strided_slice %27 {offsets = [64, 0], sizes = [8, 384], strides = [1, 1]} : vector<72x384xf32> to vector<8x384xf32>
    %272 = vector.broadcast %270 : vector<1x384xf32> to vector<8x384xf32>
    %273 = arith.mulf %272, %271 : vector<8x384xf32>
    %274 = arith.addf %269, %273 : vector<8x384xf32>
    %cst_62 = arith.constant 8.000000e+00 : f32
    %275 = vector.broadcast %cst_62 : f32 to vector<8x384xf32>
    %276 = arith.mulf %275, %274 : vector<8x384xf32>
    %c0_63 = arith.constant 0 : index
    %c24_64 = arith.constant 24 : index
    %c0_65 = arith.constant 0 : index
    %277 = vector.load %arg6[%c0_63, %c24_64, %c0_65] : memref<1x32x384xf32, #tpu.memory_space<vmem>>, vector<1x8x384xf32>
    %278 = vector.shape_cast %277 : vector<1x8x384xf32> to vector<8x384xf32>
    %279 = vector.shape_cast %276 : vector<8x384xf32> to vector<1x8x384xf32>
    tpu.vector_store %arg6[%c0_63, %c24_64, %c0_65], %279 {strides = array<i32>} : memref<1x32x384xf32, #tpu.memory_space<vmem>>, vector<1x8x384xf32>,
    return
  }
  func.func @transform_0(%arg0: i32) -> (i32, i32, i32) {
    %c0_i32 = arith.constant 0 : i32
    %c0_i32_0 = arith.constant 0 : i32
    %c0_i32_1 = arith.constant 0 : i32
    return %arg0, %c0_i32, %c0_i32_0 : i32, i32, i32
  }
  func.func @transform_1(%arg0: i32) -> (i32, i32) {
    %c0_i32 = arith.constant 0 : i32
    %c0_i32_0 = arith.constant 0 : i32
    %c0_i32_1 = arith.constant 0 : i32
    return %c0_i32, %c0_i32_0 : i32, i32
  }
  func.func @transform_2(%arg0: i32) -> (i32, i32) {
    %c0_i32 = arith.constant 0 : i32
    %c0_i32_0 = arith.constant 0 : i32
    %c0_i32_1 = arith.constant 0 : i32
    return %c0_i32, %c0_i32_0 : i32, i32
  }
  func.func @transform_3(%arg0: i32) -> (i32, i32) {
    %c0_i32 = arith.constant 0 : i32
    %c0_i32_0 = arith.constant 0 : i32
    %c0_i32_1 = arith.constant 0 : i32
    return %c0_i32, %c0_i32_0 : i32, i32
  }
  func.func @transform_4(%arg0: i32) -> (i32, i32) {
    %c0_i32 = arith.constant 0 : i32
    %c0_i32_0 = arith.constant 0 : i32
    %c0_i32_1 = arith.constant 0 : i32
    return %c0_i32, %c0_i32_0 : i32, i32
  }
  func.func @transform_5(%arg0: i32) -> (i32, i32, i32) {
    %c0_i32 = arith.constant 0 : i32
    %c0_i32_0 = arith.constant 0 : i32
    %c0_i32_1 = arith.constant 0 : i32
    return %arg0, %c0_i32, %c0_i32_0 : i32, i32, i32
  }
}

</mosaic_0001>

<bundles_post_ra>
// kernel: tpu_custom_call.1
= control target key start
LH: loop header
LB: loop body
LE: loop exit
PB: predicated region body
PF: predicated region fallthrough
CT: control target
= control target key end

     0   :  { %10 = vsyncpa [#allocation4], 0  ;;  %s3191_s0 = inlined_call_operand.vmem [shape: f32[2,8,456], index: 0, kind: input, shape index: {}]   ;;  %s3192_s1 = inlined_call_operand.vmem [shape: f32[8,72], index: 1, kind: input, shape index: {}]   ;;  %s3193_s2 = inlined_call_operand.vmem [shape: f32[8,1], index: 2, kind: input, shape index: {}]   ;;  %s3194_s3 = inlined_call_operand.vmem [shape: f32[64,8], index: 3, kind: input, shape index: {}]   ;;  %s3195_s4 = inlined_call_operand.vmem [shape: f32[64,1], index: 4, kind: input, shape index: {}]   ;;  %s3196_s5 = inlined_call_operand.hbm [shape: f32[2,32,384], index: 5, kind: output, shape index: {}]  }
   0x1   :  { %12 = vsyncpa [#allocation4 + $0x1], 0  ;;  %s2283_s18 = smov 0   ;;  %s2285_s19 = smov 0  }
   0x2   :  { %s2287_s20 = smov 0   ;;  %s2289_s21 = smov 0  }
   0x3 LB: > { %s2304_s22 = sadd.s32 4294967295, %s2236_s21   ;;  %s1930_s23 = sadd.s32 4294967294, %s2236_s21   ;;  %s2236_s21 = sphi %s2289_s21, %s3323_s21   ;;  %s2232_s20 = sphi %s2287_s20, %s3322_s20   ;;  %s2228_s19 = sphi %s2285_s19, %s3321_s19   ;;  %s2224_s18 = sphi %s2283_s18, %s3320_s18  }
   0x4   : > { %s2308_s24 = sadd.s32 1, %s2236_s21   ;;  %s135_s25 = sadd.s32 1, %s2232_s20 }
   0x5   : > { %s132_s26 = ssub.s32 %s2236_s21, %s2308_s24  ;;  %p145_p0 = scmp.ne.s32.totalorder %s2232_s20, %s2228_s19 }
   0x6   : > { %p133_p1 = scmp.eq.s32.totalorder %s132_s26, 0  ;;  %p146_p2 = scmp.eq.s32.totalorder %s2304_s22, 1 }
   0x7   : > { %p151_p3 = scmp.ne.s32.totalorder %s2228_s19, %s2224_s18  ;;  %p152_p4 = scmp.eq.s32.totalorder %s1930_s23, 1 }
   0x8   : > { %s2319_s27 = scalar_select %p133_p1, %s2232_s20, %s135_s25  }
   0x9   : > { %p2321_p5 = por %p146_p2, %p145_p0  ;;  %p2325_p6 = por %p152_p4, %p151_p3 }
   0xa   : > { %p1933_p7 = scmp.ge.s32.totalorder %s2236_s21, 1  ;;  %p190_p8 = scmp.lt.s32.totalorder %s2236_s21, 3 }
   0xc   : > { %p191_p9 = pnand %p1933_p7, %p190_p8 }
   0xe   : > { %194 = sbr.rel (%p191_p9) target bundleno = 839 (0x347), region = 40 }
  0x15   : > { %p218_p10 = scmp.lt.s32.totalorder %s2304_s22, 1  ;;  %s2238_s10 = smov 127   ;;  %v2242_v3 = vmov 0.0|0.0   ;;  %v2246_v5 = vmov 0.0   ;;  %vm2248_vm0 = vmmov 0   ;;  %v2249_v6 = vmov 0  }
  0x16   : > { %s2239_s11 = smov 126   ;;  %s2240_s12 = smov 104   ;;  %2028 = vmatprep.subr.bf16.mxu1 %v2242_v3  ;;  %539 = vmatprep.mubr.f32.mxu0 %v2246_v5  ;;  %v465_v7 = vld [vmem:[%s3193_s2] sm:$0xff]  ;;  %v629_v8 = vld [vmem:[%s3195_s4 + $0x10] sm:$0xff]  ;;  %vm245_vm1 = vcmask 1039360   ;;  %vm271_vm2 = vcmask 1031168  }
  0x17   : > { %s219_s30 = scalar_select %p218_p10, %s2304_s22, 1  ;;  %1995 = vmatprep.mubr.msk.f32.mxu1 %vm2248_vm0, %v2246_v5  ;;  %2097 = vset.pattern.permute.xlu0 %v2249_v6  ;;  %v631_v9 = vld [vmem:[%s3195_s4 + $0x20] sm:$0xff]  ;;  %v633_v10 = vld [vmem:[%s3195_s4 + $0x30] sm:$0xff]  ;;  %vm297_vm3 = vcmask 850944   ;;  %vm323_vm4 = vcmask 842752   ;;  %vm349_vm5 = vcmask 834560  }
  0x18   : > { %s2241_s13 = smov 103   ;;  %s2243_s14 = smov 102   ;;  %2098 = vset.pattern.permute.xlu1 %v2249_v6  ;;  %vm375_vm6 = vcmask 654336   ;;  %vm401_vm7 = vcmask 646144   ;;  %vm427_vm8 = vcmask 637952   ;;  %vm471_vm9 = vcmask 588800  }
  0x19   : > { %s1957_s6 = sshll.u32 %s219_s30, 5  ;;  %s2244_s15 = smov 80   ;;  %vm675_vm10 = vcmask 64512  }
  0x1a   : > { %s2336_s9 = scalar_lea.vmem %s3191_s0, %s1957_s6  ;;  %s2245_s16 = smov 79  }
  0x1b   : > { %v2339_v0 = vld [vmem:[%s2336_s9 + $0x8] sm:$0xff]  ;;  %v2342_v1 = vld [vmem:[%s2336_s9] sm:$0xff]  ;;  %v2347_v2 = vld [vmem:[%s2336_s9 + $0x10] sm:$0xff]  ;;  %s2247_s17 = smov 78   ;;  %s215_s8 = sand.u32 1, %s2228_s19  }
  0x1c   : > { %239 = vrot.lane.b32.xlu0 %v2339_v0, %s2238_s10  ;;  %237 = vrot.lane.b32.xlu1 %v2342_v1, %s2238_s10  ;;  %v232_v4 = vld [vmem:[%s2336_s9 + $0x18] sm:$0xff] }
  0x20   : > { %241 = vrot.lane.b32.xlu0 %v2347_v2, %s2238_s10  ;;  %265 = vrot.lane.b32.xlu1 %v2339_v0, %s2239_s11 }
  0x24   : > { %267 = vrot.lane.b32.xlu0 %v2347_v2, %s2239_s11  ;;  %291 = vrot.lane.b32.xlu1 %v2339_v0, %s2240_s12 }
  0x28   : > { %293 = vrot.lane.b32.xlu0 %v2347_v2, %s2240_s12  ;;  %263 = vrot.lane.b32.xlu1 %v2342_v1, %s2239_s11 }
  0x2c   : > { %289 = vrot.lane.b32.xlu0 %v2342_v1, %s2240_s12  ;;  %317 = vrot.lane.b32.xlu1 %v2339_v0, %s2241_s13 }
  0x30   : > { %319 = vrot.lane.b32.xlu0 %v2347_v2, %s2241_s13  ;;  %343 = vrot.lane.b32.xlu1 %v2339_v0, %s2243_s14 }
  0x34   : > { %345 = vrot.lane.b32.xlu0 %v2347_v2, %s2243_s14  ;;  %315 = vrot.lane.b32.xlu1 %v2342_v1, %s2241_s13 }
  0x38   : > { %341 = vrot.lane.b32.xlu0 %v2342_v1, %s2243_s14  ;;  %243 = vrot.lane.b32.xlu1 %v232_v4, %s2238_s10  ;;  %s2042_s10 = smul.u32 96, %s215_s8 }
  0x3c   : > { %369 = vrot.lane.b32.xlu0 %v2339_v0, %s2244_s15  ;;  %371 = vrot.lane.b32.xlu1 %v2347_v2, %s2244_s15 }
  0x40   : > { %395 = vrot.lane.b32.xlu0 %v2339_v0, %s2245_s16  ;;  %397 = vrot.lane.b32.xlu1 %v2347_v2, %s2245_s16 }
  0x44   : > { %367 = vrot.lane.b32.xlu0 %v2342_v1, %s2244_s15  ;;  %393 = vrot.lane.b32.xlu1 %v2342_v1, %s2245_s16 }
  0x48   : > { %269 = vrot.lane.b32.xlu0 %v232_v4, %s2239_s11  ;;  %295 = vrot.lane.b32.xlu1 %v232_v4, %s2240_s12  ;;  %s2874_s11 = scalar_lea.vmem [#allocation3], %s2042_s10 }
  0x49   : > { %s1868_s12 = sshll.u32 %s2874_s11, 4  ;;  %s3140_s12 = int_to_ptr.vmem [resolvable:$true] %s1868_s12 }
  0x4c   : > { %321 = vrot.lane.b32.xlu0 %v232_v4, %s2241_s13  ;;  %347 = vrot.lane.b32.xlu1 %v232_v4, %s2243_s14 }
  0x50   : > { %421 = vrot.lane.b32.xlu0 %v2339_v0, %s2247_s17  ;;  %423 = vrot.lane.b32.xlu1 %v2347_v2, %s2247_s17 }
  0x54   : > { %419 = vrot.lane.b32.xlu0 %v2342_v1, %s2247_s17  ;;  %373 = vrot.lane.b32.xlu1 %v232_v4, %s2244_s15 }
  0x58   : > { %399 = vrot.lane.b32.xlu0 %v232_v4, %s2245_s16  ;;  %425 = vrot.lane.b32.xlu1 %v232_v4, %s2247_s17  ;;  %s3150_s16 = scalar_lea.sflag [#allocation4], %s215_s8  ;;  %s2174_s17 = scalar_lea.vmem %s3140_s12, 1536 }
  0x59   : > { %p2175_p11 = scmp.ne.s32.totalorder %s3140_s12, %s2174_s17 }
  0x5b   : > { %p2176_p12 = pnand %p2175_p11, %p2321_p5 }
  0x5c   : > { %468 = vperm.xlu0 %2097, %v465_v7  }
  0x5d   : > { %p2177_p13 = pneg %p2176_p12 }
  0x60   : > { %647 = vperm.xlu0 %2097, %v629_v8  }
  0x64   : > { %657 = vperm.xlu0 %2097, %v631_v9  }
  0x68   : > { %667 = vperm.xlu0 %2097, %v633_v10   ;;  %v464_v10 = vld [vmem:[%s3192_s1] sm:$0xff] }
  0x8e   : > { %v240_v11 = vpop.permute.xlu0 %239  ;;  %v238_v12 = vpop.permute.xlu1 %237 }
  0x8f   : > { %v2388_v13 = vsel %vm245_vm1, %v238_v12, %v240_v11 }
  0x90   : > { %3250 = vst [vmem:[#allocation6_spill] sm:$0xff] %v2388_v13  ;;  %v2014_v18 = vpack.c.bf16 %v2388_v13, %v2342_v1 }
  0x92   : > { %v242_v14 = vpop.permute.xlu0 %241  ;;  %v266_v15 = vpop.permute.xlu1 %265 }
  0x93   : > { %v2391_v16 = vsel %vm245_vm1, %v240_v11, %v242_v14 }
  0x94   : > { %3251 = vst [vmem:[#allocation7_spill] sm:$0xff] %v2391_v16  ;;  %v2012_v17 = vpack.c.bf16 %v2391_v16, %v2339_v0 }
  0x96   : > { %v268_v19 = vpop.permute.xlu0 %267  ;;  %v292_v20 = vpop.permute.xlu1 %291  ;;  %2013 = vmatprep.subr.bf16.mxu0 %v2012_v17 }
  0x97   : > { %2015 = vmatpush1.bf16.msra.mxu0 %v2014_v18  ;;  %v2398_v23 = vsel %vm271_vm2, %v266_v15, %v268_v19 }
  0x98   : > { %3252 = vst [vmem:[#allocation8_spill] sm:$0xff] %v2398_v23 }
  0x9a   : > { %v294_v21 = vpop.permute.xlu0 %293  ;;  %v264_v22 = vpop.permute.xlu1 %263 }
  0x9b   : > { %v2401_v24 = vsel %vm297_vm3, %v292_v20, %v294_v21  ;;  %v2406_v28 = vsel %vm271_vm2, %v264_v22, %v266_v15  ;;  %v630_v22 = vld [vmem:[%s3195_s4 + $0x18] sm:$0xff] }
  0x9c   : > { %3253 = vst [vmem:[#allocation9_spill] sm:$0xff] %v2401_v24  ;;  %v2016_v25 = vpack.c.bf16 %v2401_v24, %v2398_v23  ;;  %3254 = vst [vmem:[#allocation10_spill] sm:$0xff] %v2406_v28 }
  0x9e   : > { %v290_v26 = vpop.permute.xlu0 %289  ;;  %v318_v27 = vpop.permute.xlu1 %317  ;;  %2017 = vmatprep.subr.bf16.mxu0 %v2016_v25  ;;  %v632_v25 = vld [vmem:[%s3195_s4 + $0x28] sm:$0xff] }
  0x9f   : > { %v2409_v29 = vsel %vm297_vm3, %v290_v26, %v292_v20  ;;  %v627_v20 = vld [vmem:[%s3195_s4] sm:$0xff]  ;;  %v634_v26 = vld [vmem:[%s3195_s4 + $0x38] sm:$0xff] }
  0xa0   : > { %3255 = vst [vmem:[#allocation11_spill] sm:$0xff] %v2409_v29  ;;  %v2018_v30 = vpack.c.bf16 %v2409_v29, %v2406_v28  ;;  %637 = vperm.xlu1 %2098, %v627_v20  }
  0xa2   : > { %v320_v31 = vpop.permute.xlu0 %319  ;;  %v344_v32 = vpop.permute.xlu1 %343  ;;  %2019 = vmatpush1.bf16.msra.mxu0 %v2018_v30 }
  0xa3   : > { %v2414_v35 = vsel %vm323_vm4, %v318_v27, %v320_v31 }
  0xa4   : > { %3256 = vst [vmem:[#allocation12_spill] sm:$0xff] %v2414_v35 }
  0xa6   : > { %v346_v33 = vpop.permute.xlu0 %345  ;;  %v316_v34 = vpop.permute.xlu1 %315 }
  0xa7   : > { %v2417_v36 = vsel %vm349_vm5, %v344_v32, %v346_v33  ;;  %v2422_v40 = vsel %vm323_vm4, %v316_v34, %v318_v27 }
  0xa8   : > { %3257 = vst [vmem:[#allocation13_spill] sm:$0xff] %v2417_v36  ;;  %v2020_v37 = vpack.c.bf16 %v2417_v36, %v2414_v35  ;;  %3258 = vst [vmem:[#allocation14_spill] sm:$0xff] %v2422_v40 }
  0xaa   : > { %v342_v38 = vpop.permute.xlu0 %341  ;;  %v244_v39 = vpop.permute.xlu1 %243  ;;  %2021 = vmatprep.subr.bf16.mxu0 %v2020_v37 }
  0xab   : > { %v2425_v41 = vsel %vm349_vm5, %v342_v38, %v344_v32  ;;  %v2428_v42 = vsel %vm245_vm1, %v242_v14, %v244_v39  ;;  %v619_v38 = vld [vmem:[%s3194_s3] sm:$0xff]  ;;  %v625_v39 = vld [vmem:[%s3194_s3 + $0x30] sm:$0xff] }
  0xac   : > { %3259 = vst [vmem:[#allocation15_spill] sm:$0xff] %v2425_v41  ;;  %3260 = vst [vmem:[#allocation16_spill] sm:$0xff] %v2428_v42  ;;  %v2022_v43 = vpack.c.bf16 %v2425_v41, %v2422_v40  ;;  %v2029_v44 = vpack.c.bf16 %v2428_v42, %v2347_v2 }
  0xae   : > { %v370_v45 = vpop.permute.xlu0 %369  ;;  %v372_v46 = vpop.permute.xlu1 %371  ;;  %2023 = vmatpush1.bf16.msra.mxu0 %v2022_v43  ;;  %2030 = vmatpush3.bf16.msra.mxu1 %v2029_v44  ;;  %v620_v43 = vld [vmem:[%s3194_s3 + $0x8] sm:$0xff]  ;;  %v626_v44 = vld [vmem:[%s3194_s3 + $0x38] sm:$0xff] }
  0xaf   : > { %2031 = vmatprep.subr.bf16.mxu1 %v2242_v3  ;;  %v2436_v49 = vsel %vm375_vm6, %v370_v45, %v372_v46 }
  0xb0   : > { %3261 = vst [vmem:[#allocation17_spill] sm:$0xff] %v2436_v49 }
  0xb2   : > { %v396_v47 = vpop.permute.xlu0 %395  ;;  %v398_v48 = vpop.permute.xlu1 %397 }
  0xb3   : > { %v2439_v50 = vsel %vm401_vm7, %v396_v47, %v398_v48 }
  0xb4   : > { %3262 = vst [vmem:[#allocation18_spill] sm:$0xff] %v2439_v50  ;;  %v2024_v51 = vpack.c.bf16 %v2439_v50, %v2436_v49 }
  0xb6   : > { %v368_v52 = vpop.permute.xlu0 %367  ;;  %v394_v53 = vpop.permute.xlu1 %393  ;;  %2025 = vmatprep.subr.bf16.mxu0 %v2024_v51  ;;  %v621_v51 = vld [vmem:[%s3194_s3 + $0x10] sm:$0xff] }
  0xb7   : > { %v2444_v54 = vsel %vm375_vm6, %v368_v52, %v370_v45  ;;  %v2447_v55 = vsel %vm401_vm7, %v394_v53, %v396_v47  ;;  %v622_v52 = vld [vmem:[%s3194_s3 + $0x18] sm:$0xff]  ;;  %v623_v53 = vld [vmem:[%s3194_s3 + $0x20] sm:$0xff] }
  0xb8   : > { %3263 = vst [vmem:[#allocation19_spill] sm:$0xff] %v2444_v54  ;;  %3264 = vst [vmem:[#allocation20_spill] sm:$0xff] %v2447_v55  ;;  %v2026_v56 = vpack.c.bf16 %v2447_v55, %v2444_v54 }
  0xba   : > { %v270_v57 = vpop.permute.xlu0 %269  ;;  %v296_v58 = vpop.permute.xlu1 %295  ;;  %2027 = vmatpush1.bf16.msra.mxu0 %v2026_v56  ;;  %v624_v56 = vld [vmem:[%s3194_s3 + $0x28] sm:$0xff] }
  0xbb   : > { %v2452_v59 = vsel %vm271_vm2, %v268_v19, %v270_v57  ;;  %v2455_v60 = vsel %vm297_vm3, %v294_v21, %v296_v58  ;;  %v628_v21 = vld [vmem:[%s3195_s4 + $0x8] sm:$0xff] }
  0xbc   : > { %3265 = vst [vmem:[#allocation21_spill] sm:$0xff] %v2452_v59  ;;  %3266 = vst [vmem:[#allocation22_spill] sm:$0xff] %v2455_v60  ;;  %v2032_v61 = vpack.c.bf16 %v2455_v60, %v2452_v59  ;;  %642 = vperm.xlu1 %2098, %v628_v21  }
  0xbe   : > { %v322_v62 = vpop.permute.xlu0 %321  ;;  %v348_v63 = vpop.permute.xlu1 %347  ;;  %2033 = vmatpush3.bf16.msra.mxu1 %v2032_v61 }
  0xbf   : > { %v2460_v0 = vsel %vm323_vm4, %v320_v31, %v322_v62  ;;  %v2463_v2 = vsel %vm349_vm5, %v346_v33, %v348_v63  ;;  %2034 = vmatprep.subr.bf16.mxu1 %v2242_v3 }
  0xc0   : > { %3267 = vst [vmem:[#allocation23_spill] sm:$0xff] %v2460_v0  ;;  %3268 = vst [vmem:[#allocation24_spill] sm:$0xff] %v2463_v2  ;;  %v2035_v4 = vpack.c.bf16 %v2463_v2, %v2460_v0  ;;  %652 = vperm.xlu1 %2098, %v630_v22  }
  0xc2   : > { %v422_v6 = vpop.permute.xlu0 %421  ;;  %v424_v7 = vpop.permute.xlu1 %423  ;;  %2036 = vmatpush3.bf16.msra.mxu1 %v2035_v4 }
  0xc3   : > { %v2469_v8 = vsel %vm427_vm8, %v422_v6, %v424_v7  ;;  %2037 = vmatprep.subr.bf16.mxu1 %v2242_v3 }
  0xc4   : > { %3269 = vst [vmem:[#allocation25_spill] sm:$0xff] %v2469_v8  ;;  %491 = vmatprep.subr.mxu0 %v2469_v8  ;;  %662 = vperm.xlu1 %2098, %v632_v25  }
  0xc6   : > { %v420_v9 = vpop.permute.xlu0 %419  ;;  %v374_v12 = vpop.permute.xlu1 %373 }
  0xc7   : > { %v2477_v11 = vsel %vm427_vm8, %v420_v9, %v422_v6  ;;  %v2482_v3 = vsel %vm375_vm6, %v372_v46, %v374_v12 }
  0xc8   : > { %492 = vmatpush1.msra.mxu0 %v2477_v11  ;;  %3270 = vst [vmem:[#allocation26_spill] sm:$0xff] %v2482_v3  ;;  %672 = vperm.xlu1 %2098, %v634_v26  }
  0xc9   : > { %1936 = vmatmul.mubr.msk.f32.vlgmr.msra.gmra.mrb[0].mxu0 %vm471_vm9, %v464_v10 }
  0xca   : > { %v400_v14 = vpop.permute.xlu0 %399  ;;  %764 = vmatprep.mubr.f32.mxu0 %v2246_v5  ;;  %v426_v18 = vpop.permute.xlu1 %425 }
  0xcb   : > { %v2485_v15 = vsel %vm401_vm7, %v398_v48, %v400_v14  ;;  %v2491_v19 = vsel %vm427_vm8, %v424_v7, %v426_v18 }
  0xcc   : > { %3271 = vst [vmem:[#allocation27_spill] sm:$0xff] %v2485_v15  ;;  %v2038_v17 = vpack.c.bf16 %v2485_v15, %v2482_v3  ;;  %3272 = vst [vmem:[#allocation28_spill] sm:$0xff] %v2491_v19 }
  0xce   : > { %2039 = vmatpush3.bf16.msra.mxu1 %v2038_v17 }
  0xcf   : > { %1993 = vmatprep.subr.mxu1 %v2246_v5 }
  0xd2   : > { %1994 = vmatpush3.msra.mxu1 %v2491_v19 }
  0xd3   : > { %1996 = vmatmul.mubr.msk.f32.vlgmr.msra.gmra.mrb[0].mxu1 %vm471_vm9, %v464_v10 }
  0xd4   : > { %800 = vmatprep.mubr.f32.mxu1 %v2246_v5 }
  0xdb   : > { %v469_v27 = vpop.permute.xlu0 %468 }
  0xdf   : > { %v648_v62 = vpop.permute.xlu0 %647 }
  0xe3   : > { %v2558_v4 = vpop.permute.xlu0 %657 }
 0x11f   : > { %v638_v57 = vpop.permute.xlu1 %637 }
 0x13b   : > { %v643_v58 = vpop.permute.xlu1 %642 }
 0x13f   : > { %v653_v61 = vpop.permute.xlu1 %652 }
 0x143   : > { %v2556_v63 = vpop.permute.xlu1 %662 }
 0x147   : > { %v2560_v12 = vpop.permute.xlu1 %672 }
 0x19c   : > { %v541_v30 = vpop.f32.mrb[0].mxu0 }
 0x19d   : > { %v542_v31 = vadd.f32 %v541_v30, %v469_v27  ;;  %v543_v32 = vpop.f32.mrb[1].mxu0 }
 0x19e   : > { %v544_v33 = vadd.f32 %v543_v32, %v469_v27 }
 0x19f   : > { %v616_v34 = vmax.f32 %v542_v31, 0.0 }
 0x1a0   : > { %v617_v37 = vmax.f32 %v544_v33, 0.0 }
 0x1a2   : > { %700 = vmatprep.subr.mxu0 %v617_v37  ;;  %2040 = vmatprep.subr.mxu1 %v617_v37 }
 0x1a3   : > { %701 = vmatpush1.msra.mxu0 %v616_v34  ;;  %2041 = vmatpush1.msra.mxu1 %v616_v34 }
 0x1a4   : > { %1938 = vmatmul.mubr.msk.f32.vlgmr.msra.gmra.mrb[2].mxu0 %vm675_vm10, %v619_v38  ;;  %1944 = vmatmul.mubr.msk.f32.vlgmr.msra.gmra.mrb[2].mxu1 %vm675_vm10, %v625_v39 }
 0x1a5   : > { %770 = vmatprep.mubr.f32.mxu0 %v2246_v5  ;;  %806 = vmatprep.mubr.f32.mxu1 %v2246_v5 }
 0x1a6   : > { %v612_v45 = vpop.f32.mrb[0].mxu1 }
 0x1a7   : > { %v613_v46 = vadd.f32 %v612_v45, %v469_v27  ;;  %v1997_v47 = vpop.f32.mrb[1].mxu1 }
 0x1a8   : > { %1939 = vmatmul.mubr.msk.f32.gmra.mrb[4].mxu0 %vm675_vm10, %v620_v43  ;;  %1945 = vmatmul.mubr.msk.f32.gmra.mrb[4].mxu1 %vm675_vm10, %v626_v44 }
 0x1a9   : > { %v618_v48 = vmax.f32 %v613_v46, 0.0  ;;  %776 = vmatprep.mubr.f32.mxu0 %v2246_v5  ;;  %2000 = vmatprep.mubr.msk.f32.mxu1 %vm675_vm10, %v619_v38 }
 0x1ab   : > { %1998 = vmatprep.subr.mxu1 %v618_v48 }
 0x1ac   : > { %1940 = vmatmul.mubr.msk.f32.gmra.mrb[6].mxu0 %vm675_vm10, %v621_v51  ;;  %1999 = vmatpush3.msra.mxu1 %v618_v48 }
 0x1ad   : > { %2001 = vmatmul.mubr.msk.f32.vlgmr.msra.gmra.mrb[6].mxu1 %vm675_vm10, %v620_v43  ;;  %782 = vmatprep.mubr.f32.mxu0 %v2246_v5 }
 0x1ae   : > { %2003 = vmatprep.mubr.msk.f32.mxu1 %vm675_vm10, %v621_v51 }
 0x1b0   : > { %1941 = vmatmul.mubr.msk.f32.gmra.mrb[8].mxu0 %vm675_vm10, %v622_v52 }
 0x1b1   : > { %2004 = vmatmul.mubr.msk.f32.gmra.mrb[8].mxu1 %vm675_vm10, %v622_v52  ;;  %788 = vmatprep.mubr.f32.mxu0 %v2246_v5 }
 0x1b2   : > { %2006 = vmatprep.mubr.msk.f32.mxu1 %vm675_vm10, %v623_v53 }
 0x1b4   : > { %1942 = vmatmul.mubr.msk.f32.gmra.mrb[10].mxu0 %vm675_vm10, %v623_v53 }
 0x1b5   : > { %2007 = vmatmul.mubr.msk.f32.gmra.mrb[10].mxu1 %vm675_vm10, %v624_v56  ;;  %794 = vmatprep.mubr.f32.mxu0 %v2246_v5  ;;  %v2562_v5 = vpop.permute.xlu0 %667 }
 0x1b6   : > { %2009 = vmatprep.mubr.msk.f32.mxu1 %vm675_vm10, %v625_v39 }
 0x1b8   : > { %1943 = vmatmul.mubr.msk.f32.gmra.mrb[12].mxu0 %vm675_vm10, %v624_v56 }
 0x1b9   : > { %2010 = vmatmul.mubr.msk.f32.gmra.mrb[12].mxu1 %vm675_vm10, %v626_v44 }
 0x277   : > { %v802_v6 = vpop.f32.mrb[2].mxu1  ;;  %v766_v7 = vpop.f32.mrb[2].mxu0 }
 0x278   : > { %v804_v9 = vpop.f32.mrb[3].mxu1  ;;  %v768_v10 = vpop.f32.mrb[3].mxu0  ;;  %v2565_v18 = vadd.f32 %v802_v6, %v2562_v5  ;;  %v2567_v20 = vadd.f32 %v766_v7, %v638_v57 }
 0x279   : > { %v2575_v27 = vadd.f32 %v804_v9, %v2562_v5  ;;  %v2577_v30 = vadd.f32 %v768_v10, %v638_v57 }
 0x27b   : > { %v772_v14 = vpop.f32.mrb[4].mxu0  ;;  %v808_v17 = vpop.f32.mrb[4].mxu1 }
 0x27c   : > { %v2569_v21 = vadd.f32 %v772_v14, %v643_v58  ;;  %v2572_v22 = vadd.f32 %v808_v17, %v2560_v12  ;;  %v774_v25 = vpop.f32.mrb[5].mxu0  ;;  %v810_v26 = vpop.f32.mrb[5].mxu1 }
 0x27d   : > { %v2579_v31 = vadd.f32 %v774_v25, %v643_v58  ;;  %v2582_v32 = vadd.f32 %v810_v26, %v2560_v12 }
 0x27e   : > { %v918_v33 = vmax.f32 %v2567_v20, %v2569_v21  ;;  %v1620_v34 = vmax.f32 %v2565_v18, %v2572_v22 }
 0x27f   : > { %v925_v37 = vmax.f32 %v2577_v30, %v2579_v31  ;;  %v1627_v38 = vmax.f32 %v2575_v27, %v2582_v32  ;;  %v778_v39 = vpop.f32.mrb[6].mxu0 }
 0x280   : > { %v919_v43 = vrot.slane %v918_v33, 4  ;;  %v1621_v44 = vrot.slane %v1620_v34, 4  ;;  %v780_v45 = vpop.f32.mrb[7].mxu0  ;;  %v2002_v46 = vpop.f32.mrb[6].mxu1  ;;  %v2596_v14 = vadd.f32 %v778_v39, %v648_v62 }
 0x281   : > { %v926_v47 = vrot.slane %v925_v37, 4  ;;  %v1628_v48 = vrot.slane %v1627_v38, 4  ;;  %v2592_v51 = vadd.f32 %v2002_v46, %v643_v58  ;;  %v879_v52 = vpop.f32.mrb[7].mxu1  ;;  %v2598_v17 = vadd.f32 %v780_v45, %v648_v62 }
 0x282   : > { %v920_v53 = vmax.f32 %v918_v33, %v919_v43  ;;  %v1622_v6 = vmax.f32 %v1620_v34, %v1621_v44  ;;  %v2594_v7 = vadd.f32 %v879_v52, %v638_v57 }
 0x283   : > { %v927_v9 = vmax.f32 %v925_v37, %v926_v47  ;;  %v1629_v10 = vmax.f32 %v1627_v38, %v1628_v48  ;;  %v784_v25 = vpop.f32.mrb[8].mxu0 }
 0x284   : > { %v921_v26 = vrot.slane %v920_v53, 2  ;;  %v1623_v19 = vrot.slane %v1622_v6, 2  ;;  %v932_v15 = vmax.f32 %v2594_v7, %v2592_v51  ;;  %v2602_v58 = vadd.f32 %v784_v25, %v653_v61  ;;  %v786_v46 = vpop.f32.mrb[9].mxu0  ;;  %v2005_v33 = vpop.f32.mrb[8].mxu1 }
 0x285   : > { %v928_v43 = vrot.slane %v927_v9, 2  ;;  %v1630_v34 = vrot.slane %v1629_v10, 2  ;;  %v2604_v57 = vadd.f32 %v786_v46, %v653_v61  ;;  %v2606_v37 = vadd.f32 %v2005_v33, %v653_v61  ;;  %v889_v38 = vpop.f32.mrb[9].mxu1 }
 0x286   : > { %v922_v39 = vmax.f32 %v920_v53, %v921_v26  ;;  %v1624_v44 = vmax.f32 %v1622_v6, %v1623_v19  ;;  %v933_v45 = vrot.slane %v932_v15, 4  ;;  %v1152_v47 = vmax.f32 %v2596_v14, %v2602_v58 }
 0x287   : > { %v929_v48 = vmax.f32 %v927_v9, %v928_v43  ;;  %v1631_v52 = vmax.f32 %v1629_v10, %v1630_v34  ;;  %v1159_v25 = vmax.f32 %v2598_v17, %v2604_v57  ;;  %v2612_v56 = vadd.f32 %v889_v38, %v648_v62  ;;  %v790_v3 = vpop.f32.mrb[10].mxu0 }
 0x288   : > { %v923_v2 = vrot.slane %v922_v39, 1  ;;  %v1625_v46 = vrot.slane %v1624_v44, 1  ;;  %v934_v0 = vmax.f32 %v932_v15, %v933_v45  ;;  %v1153_v61 = vrot.slane %v1152_v47, 4  ;;  %v792_v33 = vpop.f32.mrb[11].mxu0  ;;  %v2008_v60 = vpop.f32.mrb[10].mxu1 }
 0x289   : > { %v930_v53 = vrot.slane %v929_v48, 1  ;;  %v1632_v19 = vrot.slane %v1631_v52, 1  ;;  %v1160_v6 = vrot.slane %v1159_v25, 4  ;;  %v1166_v26 = vmax.f32 %v2612_v56, %v2606_v37  ;;  %v899_v9 = vpop.f32.mrb[11].mxu1 }
 0x28a   : > { %v924_v10 = vmax.f32 %v922_v39, %v923_v2  ;;  %v1626_v43 = vmax.f32 %v1624_v44, %v1625_v46  ;;  %v935_v34 = vrot.slane %v934_v0, 2  ;;  %v1154_v59 = vmax.f32 %v1152_v47, %v1153_v61 }
 0x28b   : > { %v931_v62 = vmax.f32 %v929_v48, %v930_v53  ;;  %v1633_v38 = vmax.f32 %v1631_v52, %v1632_v19  ;;  %v1161_v42 = vmax.f32 %v1159_v25, %v1160_v6  ;;  %v1167_v8 = vrot.slane %v1166_v26, 4  ;;  %v796_v50 = vpop.f32.mrb[12].mxu0 }
 0x28c   : > { %v939_v15 = vsub.f32 %v2567_v20, %v924_v10  ;;  %v942_v45 = vsub.f32 %v2569_v21, %v924_v10  ;;  %v1641_v49 = vsub.f32 %v2565_v18, %v1626_v43  ;;  %v1644_v36 = vsub.f32 %v2572_v22, %v1626_v43  ;;  %v798_v35 = vpop.f32.mrb[13].mxu0  ;;  %v2620_v24 = vpop.f32.mrb[12].mxu1 }
 0x28d   : > { %v940_v2 = vsub.f32 %v2577_v30, %v931_v62  ;;  %v943_v39 = vsub.f32 %v2579_v31, %v931_v62  ;;  %v1642_v44 = vsub.f32 %v2575_v27, %v1633_v38  ;;  %v1645_v47 = vsub.f32 %v2582_v32, %v1633_v38  ;;  %v2626_v48 = vpop.f32.mrb[13].mxu1 }
 0x28e   : > { %v945_v20 = vmul.f32 1.442695, %v939_v15  ;;  %v951_v52 = vmul.f32 1.442695, %v942_v45  ;;  %v1647_v21 = vmul.f32 1.442695, %v1641_v49  ;;  %v936_v25 = vmax.f32 %v934_v0, %v935_v34 }
 0x28f   : > { %v1653_v18 = vmul.f32 1.442695, %v1644_v36  ;;  %v947_v46 = vmul.f32 1.442695, %v940_v2  ;;  %v953_v22 = vmul.f32 1.442695, %v943_v39  ;;  %v1168_v61 = vmax.f32 %v1166_v26, %v1167_v8 }
 0x290   : > { %2099 = vpow2.f32 %v945_v20  ;;  %v1649_v53 = vmul.f32 1.442695, %v1642_v44  ;;  %v1655_v19 = vmul.f32 1.442695, %v1645_v47  ;;  %v937_v30 = vrot.slane %v936_v25, 1 }
 0x291   : > { %2101 = vpow2.f32 %v951_v52  ;;  %v1155_v31 = vrot.slane %v1154_v59, 2  ;;  %v1162_v6 = vrot.slane %v1161_v42, 2  ;;  %v1169_v27 = vrot.slane %v1168_v61, 2 }
 0x292   : > { %2103 = vpow2.f32 %v1647_v21  ;;  %v938_v32 = vmax.f32 %v936_v25, %v937_v30  ;;  %v2629_v10 = vadd.f32 %v790_v3, %v2558_v4  ;;  %v2632_v49 = vadd.f32 %v792_v33, %v2558_v4 }
 0x293   : > { %2105 = vpow2.f32 %v1653_v18  ;;  %v1156_v36 = vmax.f32 %v1154_v59, %v1155_v31  ;;  %v1163_v0 = vmax.f32 %v1161_v42, %v1162_v6  ;;  %v1170_v8 = vmax.f32 %v1168_v61, %v1169_v27 }
 0x294   : > { %2107 = vpow2.f32 %v947_v46  ;;  %v941_v26 = vsub.f32 %v2594_v7, %v938_v32  ;;  %v944_v43 = vsub.f32 %v2592_v51, %v938_v32  ;;  %v2637_v34 = vadd.f32 %v2008_v60, %v2556_v63 }
 0x295   : > { %2109 = vpow2.f32 %v953_v22  ;;  %v1157_v62 = vrot.slane %v1156_v36, 1  ;;  %v1164_v38 = vrot.slane %v1163_v0, 1  ;;  %v1171_v3 = vrot.slane %v1170_v8, 1 }
 0x296   : > { %2111 = vpow2.f32 %v1649_v53  ;;  %v949_v15 = vmul.f32 1.442695, %v941_v26  ;;  %v955_v33 = vmul.f32 1.442695, %v944_v43  ;;  %v2640_v45 = vadd.f32 %v899_v9, %v2558_v4 }
 0x297   : > { %2113 = vpow2.f32 %v1655_v19  ;;  %v1158_v42 = vmax.f32 %v1156_v36, %v1157_v62  ;;  %v1165_v59 = vmax.f32 %v1163_v0, %v1164_v38  ;;  %v1172_v2 = vmax.f32 %v1170_v8, %v1171_v3 }
 0x298   : > { %2115 = vpow2.f32 %v949_v15  ;;  %v1400_v51 = vmax.f32 %v2640_v45, %v2637_v34  ;;  %v2645_v60 = vadd.f32 %v796_v50, %v2556_v63  ;;  %v2648_v7 = vadd.f32 %v798_v35, %v2556_v63 }
 0x299   : > { %2117 = vpow2.f32 %v955_v33  ;;  %v1173_v39 = vsub.f32 %v2596_v14, %v1158_v42  ;;  %v1176_v4 = vsub.f32 %v2602_v58, %v1158_v42  ;;  %v1174_v9 = vsub.f32 %v2598_v17, %v1165_v59 }
 0x29a   : > { %v2653_v44 = vpop.eup %2099  ;;  %v1177_v47 = vsub.f32 %v2604_v57, %v1165_v59  ;;  %v1175_v20 = vsub.f32 %v2612_v56, %v1172_v2  ;;  %v1178_v52 = vsub.f32 %v2606_v37, %v1172_v2  ;;  %v1401_v50 = vrot.slane %v1400_v51, 4 }
 0x29b   : > { %v2658_v21 = vpop.eup %2101  ;;  %v1179_v35 = vmul.f32 1.442695, %v1173_v39  ;;  %v1185_v63 = vmul.f32 1.442695, %v1176_v4  ;;  %v1181_v25 = vmul.f32 1.442695, %v1174_v9  ;;  %v1386_v14 = vmax.f32 %v2629_v10, %v2645_v60 }
 0x29c   : > { %v2662_v58 = vpop.eup %2103  ;;  %v957_v17 = vadd.f32 %v2658_v21, %v2653_v44  ;;  %v1187_v18 = vmul.f32 1.442695, %v1177_v47  ;;  %v1183_v57 = vmul.f32 1.442695, %v1175_v20  ;;  %v1189_v46 = vmul.f32 1.442695, %v1178_v52 }
 0x29d   : > { %v2666_v56 = vpop.eup %2105  ;;  %2119 = vpow2.f32 %v1179_v35  ;;  %v1402_v37 = vmax.f32 %v1400_v51, %v1401_v50  ;;  %v1387_v22 = vrot.slane %v1386_v14, 4  ;;  %v1393_v61 = vmax.f32 %v2632_v49, %v2648_v7 }
 0x29e   : > { %v2670_v53 = vpop.eup %2107  ;;  %v958_v19 = vrot.slane %v957_v17, 4  ;;  %v1659_v30 = vadd.f32 %v2666_v56, %v2662_v58  ;;  %2121 = vpow2.f32 %v1185_v63  ;;  %v2676_v31 = vadd.f32 %v2620_v24, %v2560_v12 }
 0x29f   : > { %v2678_v6 = vpop.eup %2109  ;;  %2123 = vpow2.f32 %v1181_v25  ;;  %v1403_v27 = vrot.slane %v1402_v37, 2  ;;  %v1388_v32 = vmax.f32 %v1386_v14, %v1387_v22  ;;  %v1394_v36 = vrot.slane %v1393_v61, 4 }
 0x2a0   : > { %3273 = vst [vmem:[#allocation29_spill] sm:$0xff] %v2676_v31  ;;  %v2680_v0 = vpop.eup %2111  ;;  %v959_v8 = vadd.f32 %v958_v19, %v957_v17  ;;  %v1660_v26 = vrot.slane %v1659_v30, 4  ;;  %v964_v43 = vadd.f32 %v2678_v6, %v2670_v53  ;;  %2125 = vpow2.f32 %v1187_v18 }
 0x2a1   : > { %v2684_v62 = vpop.eup %2113  ;;  %2127 = vpow2.f32 %v1183_v57  ;;  %v1404_v38 = vmax.f32 %v1402_v37, %v1403_v27  ;;  %v1389_v24 = vrot.slane %v1388_v32, 2  ;;  %v1395_v12 = vmax.f32 %v1393_v61, %v1394_v36 }
 0x2a2   : > { %v2686_v3 = vpop.eup %2115  ;;  %v960_v15 = vrot.slane %v959_v8, 2  ;;  %v1661_v33 = vadd.f32 %v1660_v26, %v1659_v30  ;;  %v965_v42 = vrot.slane %v964_v43, 4  ;;  %v1666_v59 = vadd.f32 %v2684_v62, %v2680_v0 }
 0x2a3   : > { %v2690_v2 = vpop.eup %2117  ;;  %v3274_v51 = vlaneseq  ;;  %2129 = vpow2.f32 %v1189_v46  ;;  %v1405_v4 = vrot.slane %v1404_v38, 1  ;;  %v1390_v9 = vmax.f32 %v1388_v32, %v1389_v24 }
 0x2a4   : > { %v961_v47 = vadd.f32 %v960_v15, %v959_v8  ;;  %v1662_v20 = vrot.slane %v1661_v33, 2  ;;  %v966_v52 = vadd.f32 %v965_v42, %v964_v43  ;;  %v1667_v50 = vrot.slane %v1666_v59, 4 }
 0x2a5   : > { %v2693_v39 = vshrl.u32 %v3274_v51, 7  ;;  %v971_v35 = vadd.f32 %v2690_v2, %v2686_v3  ;;  %v1406_v63 = vmax.f32 %v1404_v38, %v1405_v4  ;;  %v1391_v25 = vrot.slane %v1390_v9, 1 }
 0x2a6   : > { %v1396_v14 = vrot.slane %v1395_v12, 2  ;;  %v962_v17 = vrot.slane %v961_v47, 1  ;;  %v1663_v18 = vadd.f32 %v1662_v20, %v1661_v33  ;;  %v967_v57 = vrot.slane %v966_v52, 2 }
 0x2a7   : > { %v1668_v37 = vadd.f32 %v1667_v50, %v1666_v59  ;;  %v2697_v22 = vpop.eup %2119  ;;  %v972_v61 = vrot.slane %v971_v35, 4  ;;  %v1409_v46 = vsub.f32 %v2640_v45, %v1406_v63  ;;  %v1412_v19 = vsub.f32 %v2637_v34, %v1406_v63 }
 0x2a8   : > { %v1392_v30 = vmax.f32 %v1390_v9, %v1391_v25  ;;  %v2701_v27 = vpop.eup %2121  ;;  %v963_v32 = vadd.f32 %v962_v17, %v961_v47  ;;  %v1664_v36 = vrot.slane %v1663_v18, 1  ;;  %v968_v8 = vadd.f32 %v967_v57, %v966_v52 }
 0x2a9   : > { %v1669_v26 = vrot.slane %v1668_v37, 2  ;;  %v2703_v43 = vpop.eup %2123  ;;  %v2706_v38 = vsub.s32 0, %v2693_v39  ;;  %v2709_v24 = vsub.s32 1, %v2693_v39  ;;  %v973_v15 = vadd.f32 %v972_v61, %v971_v35 }
 0x2aa   : > { %3275 = vst [vmem:[#allocation30_spill] sm:$0xff] %v2703_v43  ;;  %v1191_v45 = vadd.f32 %v2701_v27, %v2697_v22  ;;  %v2713_v34 = vpop.eup %2125  ;;  %2131 = vrcp.f32 %v963_v32  ;;  %v1665_v33 = vadd.f32 %v1664_v36, %v1663_v18  ;;  %v969_v42 = vrot.slane %v968_v8, 1 }
 0x2ab   : > { %3276 = vst [vmem:[#allocation31_spill] sm:$0xff] %v2713_v34  ;;  %v1670_v59 = vadd.f32 %v1669_v26, %v1668_v37  ;;  %v2715_v51 = vpop.eup %2127  ;;  %v2718_v4 = vsub.s32 2, %v2693_v39  ;;  %v974_v9 = vrot.slane %v973_v15, 2  ;;  %v1198_v20 = vadd.f32 %v2713_v34, %v2703_v43 }
 0x2ac   : > { %3277 = vst [vmem:[#allocation32_spill] sm:$0xff] %v2715_v51  ;;  %v1192_v47 = vrot.slane %v1191_v45, 4  ;;  %v970_v52 = vadd.f32 %v969_v42, %v968_v8  ;;  %v1407_v35 = vsub.f32 %v2629_v10, %v1392_v30  ;;  %v1397_v63 = vmax.f32 %v1395_v12, %v1396_v14 }
 0x2ad   : > { %v1671_v50 = vrot.slane %v1670_v59, 1  ;;  %v2723_v25 = vpop.eup %2129  ;;  %v975_v17 = vadd.f32 %v974_v9, %v973_v15  ;;  %v1199_v57 = vrot.slane %v1198_v20, 4  ;;  %v1417_v37 = vmul.f32 1.442695, %v1409_v46 }
 0x2ae   : > { %3278 = vst [vmem:[#allocation33_spill] sm:$0xff] %v2723_v25  ;;  %v1193_v18 = vadd.f32 %v1192_v47, %v1191_v45  ;;  %2133 = vrcp.f32 %v1665_v33  ;;  %v1205_v32 = vadd.f32 %v2723_v25, %v2715_v51  ;;  %v1410_v36 = vsub.f32 %v2645_v60, %v1392_v30  ;;  %v2837_v51 = vld [vmem:[%s2336_s9 + $0x8] sm:$0xff] }
 0x2af   : > { %v1672_v61 = vadd.f32 %v1671_v50, %v1670_v59  ;;  %2135 = vrcp.f32 %v970_v52  ;;  %v976_v26 = vrot.slane %v975_v17, 1  ;;  %v1200_v42 = vadd.f32 %v1199_v57, %v1198_v20  ;;  %3281 = vst [vmem:[#allocation36_spill] sm:$0xff] %v2837_v51 }
 0x2b0   : > { %v1194_v8 = vrot.slane %v1193_v18, 2  ;;  %v2729_v10 = vsub.s32 3, %v2693_v39  ;;  %v1206_v12 = vrot.slane %v1205_v32, 4  ;;  %v1398_v14 = vrot.slane %v1397_v63, 1 }
 0x2b1   : > { %2137 = vrcp.f32 %v1672_v61  ;;  %v1201_v45 = vrot.slane %v1200_v42, 2  ;;  %v1423_v46 = vmul.f32 1.442695, %v1412_v19  ;;  %v1413_v59 = vmul.f32 1.442695, %v1407_v35 }
 0x2b2   : > { %v1195_v15 = vadd.f32 %v1194_v8, %v1193_v18  ;;  %2139 = vpow2.f32 %v1417_v37  ;;  %v1207_v33 = vadd.f32 %v1206_v12, %v1205_v32  ;;  %v2731_v9 = vmax.f32 %v1397_v63, %v1398_v14 }
 0x2b3   : > { %v2735_v60 = vadd.f32 %v2626_v48, %v2562_v5  ;;  %v977_v30 = vadd.f32 %v976_v26, %v975_v17  ;;  %v2737_v20 = vadd.f32 %v1201_v45, %v1200_v42  ;;  %v1419_v52 = vmul.f32 1.442695, %v1410_v36 }
 0x2b4   : > { %v1196_v47 = vrot.slane %v1195_v15, 1  ;;  %v2132_v50 = vpop.eup %2131  ;;  %v1208_v57 = vrot.slane %v1207_v33, 2  ;;  %v2750_v63 = vsub.s32 4, %v2693_v39  ;;  %2141 = vpow2.f32 %v1423_v46 }
 0x2b5   : > { %3279 = vst [vmem:[#allocation34_spill] sm:$0xff] %v2735_v60  ;;  %v2745_v35 = vmax.f32 %v2735_v60, %v2676_v31  ;;  %v981_v5 = vmul.f32 %v2132_v50, %v2653_v44  ;;  %v984_v48 = vmul.f32 %v2132_v50, %v2658_v21  ;;  %v2753_v17 = vsub.s32 5, %v2693_v39 }
 0x2b6   : > { %v2756_v37 = vsub.s32 6, %v2693_v39  ;;  %v2759_v61 = vsub.s32 7, %v2693_v39  ;;  %2143 = vpow2.f32 %v1413_v59  ;;  %v2764_v26 = vadd.f32 %v1196_v47, %v1195_v15 }
 0x2b7   : > { %v990_v32 = vrot.slane %v981_v5, %v2706_v38  ;;  %v1005_v44 = vrot.slane %v981_v5, %v2709_v24  ;;  %v1023_v21 = vrot.slane %v981_v5, %v2718_v4  ;;  %2145 = vpow2.f32 %v1419_v52 }
 0x2b8   : > { %v2134_v36 = vpop.eup %2133  ;;  %2147 = vrcp.f32 %v977_v30  ;;  %v2767_v42 = vadd.f32 %v1208_v57, %v1207_v33  ;;  %v1041_v45 = vrot.slane %v981_v5, %v2729_v10  ;;  %v1059_v46 = vrot.slane %v981_v5, %v2750_v63 }
 0x2b9   : > { %v2136_v12 = vpop.eup %2135  ;;  %v999_v39 = vmul.f32 %v990_v32, %v2342_v1  ;;  %v1014_v14 = vmul.f32 %v1005_v44, %v2388_v13  ;;  %v1032_v52 = vmul.f32 %v1023_v21, %v2406_v28  ;;  %v1077_v30 = vrot.slane %v981_v5, %v2753_v17 }
 0x2ba   : > { %v1095_v15 = vrot.slane %v981_v5, %v2756_v37  ;;  %v1113_v47 = vrot.slane %v981_v5, %v2759_v61  ;;  %v1131_v1 = vrot.slane %v984_v48, %v2706_v38  ;;  %v1683_v57 = vmul.f32 %v2134_v36, %v2662_v58 }
 0x2bb   : > { %v2138_v59 = vpop.eup %2137  ;;  %v1017_v50 = vadd.f32 %v1014_v14, %v999_v39  ;;  %v2782_v32 = vmul.f32 %v2134_v36, %v2666_v56  ;;  %v2785_v44 = vmul.f32 %v2136_v12, %v2670_v53  ;;  %v2788_v21 = vmul.f32 %v2136_v12, %v2678_v6 }
 0x2bc   : > { %v2777_v33 = vpop.eup %2139  ;;  %v2791_v19 = vmul.f32 %v2138_v59, %v2680_v0  ;;  %v2794_v5 = vmul.f32 %v2138_v59, %v2684_v62  ;;  %v1050_v48 = vmul.f32 %v1041_v45, %v2409_v29  ;;  %v1692_v58 = vrot.slane %v1683_v57, %v2706_v38  ;;  %v2806_v62 = vld [vmem:[%s2336_s9] sm:$0xff] }
 0x2bd   : > { %v1035_v39 = vadd.f32 %v1032_v52, %v1017_v50  ;;  %v1707_v56 = vrot.slane %v1683_v57, %v2709_v24  ;;  %v1068_v36 = vmul.f32 %v1059_v46, %v2422_v40  ;;  %v1086_v53 = vmul.f32 %v1077_v30, %v2425_v41 }
 0x2be   : > { %v1104_v6 = vmul.f32 %v1095_v15, %v2444_v54  ;;  %v1725_v12 = vrot.slane %v1683_v57, %v2718_v4  ;;  %v2803_v0 = vpop.eup %2141  ;;  %v1701_v59 = vmul.f32 %v2806_v62, %v1692_v58  ;;  %v1743_v52 = vrot.slane %v1683_v57, %v2729_v10 }
 0x2bf   : > { %v1053_v14 = vadd.f32 %v1050_v48, %v1035_v39  ;;  %v1716_v45 = vmul.f32 %v1707_v56, %v2388_v13  ;;  %v1122_v46 = vmul.f32 %v1113_v47, %v2447_v55  ;;  %v1140_v30 = vmul.f32 %v1131_v1, %v2477_v11 }
 0x2c0   : > { %v2811_v50 = vpop.eup %2143  ;;  %v1761_v15 = vrot.slane %v1683_v57, %v2750_v63  ;;  %v1779_v18 = vrot.slane %v1683_v57, %v2753_v17  ;;  %v1734_v56 = vmul.f32 %v1725_v12, %v2406_v28  ;;  %v1797_v8 = vrot.slane %v1683_v57, %v2756_v37 }
 0x2c1   : > { %v2817_v39 = vpop.eup %2145  ;;  %v1071_v48 = vadd.f32 %v1068_v36, %v1053_v14  ;;  %v1719_v58 = vadd.f32 %v1716_v45, %v1701_v59  ;;  %v1815_v60 = vrot.slane %v1683_v57, %v2759_v61  ;;  %v994_v47 = vrot.slane %v2785_v44, %v2706_v38 }
 0x2c2   : > { %3280 = vst [vmem:[#allocation35_spill] sm:$0xff] %v2817_v39  ;;  %v2821_v31 = vpop.eup %2147  ;;  %v1009_v1 = vrot.slane %v2785_v44, %v2709_v24  ;;  %v1027_v36 = vrot.slane %v2785_v44, %v2718_v4  ;;  %v1752_v12 = vmul.f32 %v1743_v52, %v2409_v29  ;;  %v1045_v45 = vrot.slane %v2785_v44, %v2729_v10 }
 0x2c3   : > { %v1089_v14 = vadd.f32 %v1086_v53, %v1071_v48  ;;  %v1737_v59 = vadd.f32 %v1734_v56, %v1719_v58  ;;  %v1770_v57 = vmul.f32 %v1761_v15, %v2422_v40  ;;  %v1788_v25 = vmul.f32 %v1779_v18, %v2425_v41 }
 0x2c4   : > { %v1000_v34 = vmul.f32 %v2837_v51, %v994_v47  ;;  %v1015_v43 = vmul.f32 %v1009_v1, %v2391_v16  ;;  %v1806_v53 = vmul.f32 %v1797_v8, %v2444_v54  ;;  %v1063_v52 = vrot.slane %v2785_v44, %v2750_v63  ;;  %v3282_v1 = vld [vmem:[#allocation9_spill] sm:$0xff] }
 0x2c5   : > { %v1107_v28 = vadd.f32 %v1104_v6, %v1089_v14  ;;  %v1755_v13 = vadd.f32 %v1752_v12, %v1737_v59  ;;  %v1824_v48 = vmul.f32 %v1815_v60, %v2447_v55  ;;  %v1833_v18 = vrot.slane %v2782_v32, %v2706_v38  ;;  %v3283_v59 = vld [vmem:[#allocation12_spill] sm:$0xff] }
 0x2c6   : > { %v1018_v15 = vadd.f32 %v1015_v43, %v1000_v34  ;;  %v1033_v58 = vmul.f32 %v1027_v36, %v2398_v23  ;;  %v1051_v6 = vmul.f32 %v1045_v45, %v3282_v1  ;;  %v1081_v8 = vrot.slane %v2785_v44, %v2753_v17 }
 0x2c7   : > { %v1125_v56 = vadd.f32 %v1122_v46, %v1107_v28  ;;  %v1773_v47 = vadd.f32 %v1770_v57, %v1755_v13  ;;  %v1069_v12 = vmul.f32 %v1063_v52, %v3283_v59  ;;  %v1099_v54 = vrot.slane %v2785_v44, %v2756_v37 }
 0x2c8   : > { %v1036_v14 = vadd.f32 %v1033_v58, %v1018_v15  ;;  %v1117_v60 = vrot.slane %v2785_v44, %v2759_v61  ;;  %v1135_v28 = vrot.slane %v2788_v21, %v2706_v38  ;;  %v1696_v13 = vrot.slane %v2791_v19, %v2706_v38  ;;  %v3284_v15 = vld [vmem:[#allocation13_spill] sm:$0xff] }
 0x2c9   : > { %v1143_v32 = vadd.f32 %v1140_v30, %v1125_v56  ;;  %v1791_v43 = vadd.f32 %v1788_v25, %v1773_v47  ;;  %v1711_v46 = vrot.slane %v2791_v19, %v2709_v24  ;;  %v1729_v36 = vrot.slane %v2791_v19, %v2718_v4 }
 0x2ca   : > { %v1054_v34 = vadd.f32 %v1051_v6, %v1036_v14  ;;  %v1747_v45 = vrot.slane %v2791_v19, %v2729_v10  ;;  %v1702_v25 = vmul.f32 %v2837_v51, %v1696_v13  ;;  %v1765_v21 = vrot.slane %v2791_v19, %v2750_v63  ;;  %v3285_v6 = vld [vmem:[#allocation17_spill] sm:$0xff] }
 0x2cb   : > { %v1146_v57 = vmul.f32 8.0, %v1143_v32  ;;  %v1809_v44 = vadd.f32 %v1806_v53, %v1791_v43  ;;  %v1842_v30 = vmul.f32 %v1833_v18, %v2477_v11  ;;  %v1087_v58 = vmul.f32 %v1081_v8, %v3284_v15  ;;  %v3286_v53 = vld [vmem:[#allocation18_spill] sm:$0xff]  ;;  %v3287_v43 = vld [vmem:[#allocation25_spill] sm:$0xff] }
 0x2cc   : > { %v1072_v52 = vadd.f32 %v1069_v12, %v1054_v34  ;;  %v1717_v56 = vmul.f32 %v1711_v46, %v2391_v16  ;;  %v1105_v14 = vmul.f32 %v1099_v54, %v3285_v6  ;;  %v1123_v32 = vmul.f32 %v1117_v60, %v3286_v53 }
 0x2cd   : > { %1149 = vst [vmem:[%s2874_s11] sm:$0xff] %v1146_v57  ;;  %v1827_v47 = vadd.f32 %v1824_v48, %v1809_v44  ;;  %v1141_v13 = vmul.f32 %v1135_v28, %v3287_v43  ;;  %v1735_v18 = vmul.f32 %v1729_v36, %v2398_v23  ;;  %v1753_v12 = vmul.f32 %v1747_v45, %v3282_v1 }
 0x2ce   : > { %v1090_v55 = vadd.f32 %v1087_v58, %v1072_v52  ;;  %v1720_v51 = vadd.f32 %v1717_v56, %v1702_v25  ;;  %v1771_v34 = vmul.f32 %v1765_v21, %v3283_v59  ;;  %v1783_v46 = vrot.slane %v2791_v19, %v2753_v17 }
 0x2cf   : > { %v1845_v8 = vadd.f32 %v1842_v30, %v1827_v47  ;;  %v2887_v54 = vmul.f32 %v2821_v31, %v2686_v3  ;;  %v1801_v28 = vrot.slane %v2791_v19, %v2756_v37  ;;  %v1819_v36 = vrot.slane %v2791_v19, %v2759_v61  ;;  %v2908_v30 = vld [vmem:[%s2336_s9 + $0x10] sm:$0xff]  ;;  %s2043_s9 = smul.u32 1536, %s2304_s22  ;;  %s2250_s22 = smov [#allocation3]  }
 0x2d0   : > { %v1108_v48 = vadd.f32 %v1105_v14, %v1090_v55  ;;  %v1738_v60 = vadd.f32 %v1735_v18, %v1720_v51  ;;  %v2895_v57 = vmul.f32 %v2821_v31, %v2690_v2  ;;  %v1837_v51 = vrot.slane %v2794_v5, %v2706_v38  ;;  %v3288_v2 = vld [vmem:[#allocation16_spill] sm:$0xff]  ;;  %s2178_s23 = sshll.u32 %s2250_s22, 4  ;;  %s2179_s23 = int_to_ptr.vmem [resolvable:$false] %s2178_s23 }
 0x2d1   : > { %v1848_v45 = vmul.f32 8.0, %v1845_v8  ;;  %v998_v44 = vrot.slane %v2887_v54, %v2706_v38  ;;  %v1013_v3 = vrot.slane %v2887_v54, %v2709_v24  ;;  %v1031_v21 = vrot.slane %v2887_v54, %v2718_v4  ;;  %s3145_s15 = scalar_lea.hbm %s3196_s5, %s2043_s9  ;;  %s2180_s25 = scalar_lea.vmem %s2179_s23, 3072 }
 0x2d2   : > { %v1126_v25 = vadd.f32 %v1123_v32, %v1108_v48  ;;  %v1756_v55 = vadd.f32 %v1753_v12, %v1738_v60  ;;  %v1789_v19 = vmul.f32 %v1783_v46, %v3284_v15  ;;  %v1049_v58 = vrot.slane %v2887_v54, %v2729_v10  ;;  %v3289_v12 = vld [vmem:[#allocation21_spill] sm:$0xff]  ;;  %p2181_p0 = scmp.lt.s32.totalorder %s3140_s12, %s2179_s23  ;;  %p2182_p1 = scmp.lt.s32.totalorder %s2180_s25, %s2174_s17 }
 0x2d3   : > { %1851 = vst [vmem:[%s2874_s11 + $0x48] sm:$0xff] %v1848_v45  ;;  %v1001_v31 = vmul.f32 %v2908_v30, %v998_v44  ;;  %v1016_v52 = vmul.f32 %v1013_v3, %v3288_v2  ;;  %v1067_v5 = vrot.slane %v2887_v54, %v2750_v63  ;;  %v1085_v14 = vrot.slane %v2887_v54, %v2753_v17  ;;  %v3290_v44 = vld [vmem:[#allocation22_spill] sm:$0xff] }
 0x2d4   : > { %v1144_v56 = vadd.f32 %v1141_v13, %v1126_v25  ;;  %v1774_v47 = vadd.f32 %v1771_v34, %v1756_v55  ;;  %v1807_v32 = vmul.f32 %v1801_v28, %v3285_v6  ;;  %v1034_v8 = vmul.f32 %v1031_v21, %v3289_v12  ;;  %v3292_v21 = vld [vmem:[#allocation23_spill] sm:$0xff]  ;;  %p2183_p2 = por %p2182_p1, %p2181_p0 }
 0x2d5   : > { %v1019_v18 = vadd.f32 %v1016_v52, %v1001_v31  ;;  %v1635_v46 = vrot.slane %v2745_v35, 4  ;;  %v1825_v45 = vmul.f32 %v1819_v36, %v3286_v53  ;;  %v1843_v13 = vmul.f32 %v1837_v51, %v3287_v43  ;;  %v3293_v52 = vld [vmem:[#allocation24_spill] sm:$0xff] }
 0x2d6   : > { %v1147_v48 = vmul.f32 8.0, %v1144_v56  ;;  %v1792_v60 = vadd.f32 %v1789_v19, %v1774_v47  ;;  %v1052_v3 = vmul.f32 %v1049_v58, %v3290_v44  ;;  %2149 = vrcp.f32 %v2764_v26  ;;  %p2184_p3 = pnand %p2183_p2, %p2177_p13 }
 0x2d7   : > { %v1037_v34 = vadd.f32 %v1034_v8, %v1019_v18  ;;  %v3291_v25 = vrot.slane %v2737_v20, 1  ;;  %v1070_v31 = vmul.f32 %v1067_v5, %v3292_v21  ;;  %v1088_v56 = vmul.f32 %v1085_v14, %v3293_v52 }
 0x2d8   : > { %1150 = vst [vmem:[%s2874_s11 + $0x8] sm:$0xff] %v1147_v48  ;;  %v1810_v55 = vadd.f32 %v1807_v32, %v1792_v60  ;;  %v1210_v19 = vrot.slane %v2767_v42, 1  ;;  %v1103_v51 = vrot.slane %v2887_v54, %v2756_v37  ;;  %v1439_v58 = vadd.f32 %v2803_v0, %v2777_v33 }
 0x2d9   : > { %v1204_v28 = vadd.f32 %v3291_v25, %v2737_v20  ;;  %v1055_v36 = vadd.f32 %v1052_v3, %v1037_v34  ;;  %v1425_v26 = vadd.f32 %v2817_v39, %v2811_v50  ;;  %v1121_v20 = vrot.slane %v2887_v54, %v2759_v61 }
 0x2da   : > { %v1828_v47 = vadd.f32 %v1825_v45, %v1810_v55  ;;  %v1211_v5 = vadd.f32 %v1210_v19, %v2767_v42  ;;  %v1636_v14 = vmax.f32 %v2745_v35, %v1635_v46  ;;  %v1440_v18 = vrot.slane %v1439_v58, 4  ;;  %v3294_v45 = vld [vmem:[#allocation26_spill] sm:$0xff]  ;;  %v3295_v35 = vld [vmem:[#allocation27_spill] sm:$0xff] }
 0x2db   : > { %v1073_v32 = vadd.f32 %v1070_v31, %v1055_v36  ;;  %2151 = vrcp.f32 %v1204_v28  ;;  %v1426_v8 = vrot.slane %v1425_v26, 4  ;;  %v1139_v60 = vrot.slane %v2895_v57, %v2706_v38 }
 0x2dc   : > { %v1846_v48 = vadd.f32 %v1843_v13, %v1828_v47  ;;  %2153 = vrcp.f32 %v1211_v5  ;;  %v1637_v34 = vrot.slane %v1636_v14, 2  ;;  %v1106_v25 = vmul.f32 %v1103_v51, %v3294_v45  ;;  %v3297_v5 = vld [vmem:[#allocation28_spill] sm:$0xff] }
 0x2dd   : > { %v1091_v3 = vadd.f32 %v1088_v56, %v1073_v32  ;;  %v1441_v55 = vadd.f32 %v1440_v18, %v1439_v58  ;;  %v1427_v54 = vadd.f32 %v1426_v8, %v1425_v26  ;;  %v1124_v46 = vmul.f32 %v1121_v20, %v3295_v35 }
 0x2de   : > { %v1849_v39 = vmul.f32 8.0, %v1846_v48  ;;  %v1638_v42 = vmax.f32 %v1636_v14, %v1637_v34  ;;  %v3296_v13 = vsub.f32 %v2632_v49, %v2731_v9  ;;  %v1142_v56 = vmul.f32 %v1139_v60, %v3297_v5  ;;  %v3299_v34 = vld [vmem:[#allocation6_spill] sm:$0xff] }
 0x2df   : > { %v1109_v19 = vadd.f32 %v1106_v25, %v1091_v3  ;;  %v1442_v28 = vrot.slane %v1441_v55, 2  ;;  %v1428_v31 = vrot.slane %v1427_v54, 2  ;;  %v3298_v51 = vsub.f32 %v2648_v7, %v2731_v9 }
 0x2e0   : > { %1852 = vst [vmem:[%s2874_s11 + $0x50] sm:$0xff] %v1849_v39  ;;  %v1415_v36 = vmul.f32 1.442695, %v3296_v13  ;;  %v2150_v57 = vpop.eup %2149  ;;  %v1639_v20 = vrot.slane %v1638_v42, 1  ;;  %v3300_v13 = vld [vmem:[#allocation10_spill] sm:$0xff] }
 0x2e1   : > { %v1127_v47 = vadd.f32 %v1124_v46, %v1109_v19  ;;  %v1421_v58 = vmul.f32 1.442695, %v3298_v51  ;;  %v1215_v26 = vmul.f32 %v2150_v57, %v2697_v22  ;;  %v1218_v14 = vmul.f32 %v2150_v57, %v2701_v27  ;;  %v3301_v57 = vld [vmem:[#allocation30_spill] sm:$0xff] }
 0x2e2   : > { %v1443_v39 = vadd.f32 %v1442_v28, %v1441_v55  ;;  %v2956_v18 = vadd.f32 %v1428_v31, %v1427_v54  ;;  %2155 = vpow2.f32 %v1415_v36  ;;  %v2965_v55 = vmax.f32 %v1638_v42, %v1639_v20  ;;  %v3303_v20 = vld [vmem:[#allocation32_spill] sm:$0xff] }
 0x2e3   : > { %v1145_v32 = vadd.f32 %v1142_v56, %v1127_v47  ;;  %v1224_v49 = vrot.slane %v1215_v26, %v2706_v38  ;;  %v1239_v8 = vrot.slane %v1215_v26, %v2709_v24  ;;  %v1257_v48 = vrot.slane %v1215_v26, %v2718_v4  ;;  %v3302_v56 = vld [vmem:[#allocation31_spill] sm:$0xff] }
 0x2e4   : > { %v1275_v9 = vrot.slane %v1215_v26, %v2729_v10  ;;  %2157 = vpow2.f32 %v1421_v58  ;;  %v1293_v25 = vrot.slane %v1215_v26, %v2750_v63  ;;  %v1311_v54 = vrot.slane %v1215_v26, %v2753_v17 }
 0x2e5   : > { %v2152_v60 = vpop.eup %2151  ;;  %v1148_v7 = vmul.f32 8.0, %v1145_v32  ;;  %v1233_v27 = vmul.f32 %v2806_v62, %v1224_v49  ;;  %v1248_v3 = vmul.f32 %v1239_v8, %v3299_v34  ;;  %v1329_v19 = vrot.slane %v1215_v26, %v2756_v37  ;;  %v3304_v49 = vld [vmem:[#allocation33_spill] sm:$0xff] }
 0x2e6   : > { %v2154_v22 = vpop.eup %2153  ;;  %v1444_v46 = vrot.slane %v1443_v39, 1  ;;  %v1266_v36 = vmul.f32 %v1257_v48, %v3300_v13  ;;  %v1216_v47 = vmul.f32 %v2152_v60, %v3301_v57  ;;  %v1219_v51 = vmul.f32 %v2152_v60, %v3302_v56  ;;  %v3305_v60 = vld [vmem:[#allocation19_spill] sm:$0xff] }
 0x2e7   : > { %1151 = vst [vmem:[%s2874_s11 + $0x10] sm:$0xff] %v1148_v7  ;;  %v1251_v31 = vadd.f32 %v1248_v3, %v1233_v27  ;;  %v1284_v58 = vmul.f32 %v1275_v9, %v2409_v29  ;;  %v1347_v42 = vrot.slane %v1215_v26, %v2759_v61  ;;  %v2977_v32 = vmul.f32 %v2154_v22, %v3303_v20 }
 0x2e8   : > { %v2980_v8 = vmul.f32 %v2154_v22, %v3304_v49  ;;  %v1302_v28 = vmul.f32 %v1293_v25, %v2422_v40  ;;  %v1228_v27 = vrot.slane %v1216_v47, %v2706_v38  ;;  %v1243_v48 = vrot.slane %v1216_v47, %v2709_v24  ;;  %v3306_v22 = vld [vmem:[#allocation36_spill] sm:$0xff] }
 0x2e9   : > { %v1269_v7 = vadd.f32 %v1266_v36, %v1251_v31  ;;  %v1320_v3 = vmul.f32 %v1311_v54, %v2425_v41  ;;  %v1338_v57 = vmul.f32 %v1329_v19, %v3305_v60  ;;  %v1261_v9 = vrot.slane %v1216_v47, %v2718_v4  ;;  %v3307_v25 = vld [vmem:[#allocation20_spill] sm:$0xff] }
 0x2ea   : > { %v1279_v26 = vrot.slane %v1216_v47, %v2729_v10  ;;  %v1365_v20 = vrot.slane %v1218_v14, %v2706_v38  ;;  %v1234_v49 = vmul.f32 %v3306_v22, %v1228_v27  ;;  %v1249_v31 = vmul.f32 %v1243_v48, %v2391_v16 }
 0x2eb   : > { %v1287_v56 = vadd.f32 %v1284_v58, %v1269_v7  ;;  %v1356_v36 = vmul.f32 %v1347_v42, %v3307_v25  ;;  %v1297_v40 = vrot.slane %v1216_v47, %v2750_v63  ;;  %v1315_v29 = vrot.slane %v1216_v47, %v2753_v17 }
 0x2ec   : > { %v1445_v54 = vadd.f32 %v1444_v46, %v1443_v39  ;;  %v2995_v41 = vpop.eup %2155  ;;  %v1252_v60 = vadd.f32 %v1249_v31, %v1234_v49  ;;  %v1267_v13 = vmul.f32 %v1261_v9, %v2398_v23  ;;  %v1333_v58 = vrot.slane %v1216_v47, %v2756_v37 }
 0x2ed   : > { %v1305_v19 = vadd.f32 %v1302_v28, %v1287_v56  ;;  %v1285_v7 = vmul.f32 %v1279_v26, %v3282_v1  ;;  %v1232_v42 = vrot.slane %v2977_v32, %v2706_v38  ;;  %v1247_v27 = vrot.slane %v2977_v32, %v2709_v24 }
 0x2ee   : > { %v2999_v14 = vpop.eup %2157  ;;  %v1265_v39 = vrot.slane %v2977_v32, %v2718_v4  ;;  %v1270_v28 = vadd.f32 %v1267_v13, %v1252_v60  ;;  %v1351_v48 = vrot.slane %v1216_v47, %v2759_v61  ;;  %v1369_v9 = vrot.slane %v1219_v51, %v2706_v38 }
 0x2ef   : > { %v1323_v46 = vadd.f32 %v1320_v3, %v1305_v19  ;;  %v1374_v56 = vmul.f32 %v1365_v20, %v2477_v11  ;;  %v1235_v49 = vmul.f32 %v2908_v30, %v1232_v42  ;;  %v1250_v26 = vmul.f32 %v1247_v27, %v3288_v2 }
 0x2f0   : > { %v1283_v31 = vrot.slane %v2977_v32, %v2729_v10  ;;  %v1288_v23 = vadd.f32 %v1285_v7, %v1270_v28  ;;  %v1303_v16 = vmul.f32 %v1297_v40, %v3283_v59  ;;  %v1301_v13 = vrot.slane %v2977_v32, %v2750_v63  ;;  %v3309_v28 = vld [vmem:[#allocation34_spill] sm:$0xff] }
 0x2f1   : > { %v1341_v1 = vadd.f32 %v1338_v57, %v1323_v46  ;;  %v1321_v47 = vmul.f32 %v1315_v29, %v3284_v15  ;;  %v1339_v51 = vmul.f32 %v1333_v58, %v3285_v6  ;;  %v1253_v3 = vadd.f32 %v1250_v26, %v1235_v49  ;;  %v3310_v26 = vld [vmem:[#allocation29_spill] sm:$0xff] }
 0x2f2   : > { %v1268_v60 = vmul.f32 %v1265_v39, %v3289_v12  ;;  %v1306_v19 = vadd.f32 %v1303_v16, %v1288_v23  ;;  %v1357_v42 = vmul.f32 %v1351_v48, %v3286_v53  ;;  %v1375_v27 = vmul.f32 %v1369_v9, %v3287_v43 }
 0x2f3   : > { %v1359_v20 = vadd.f32 %v1356_v36, %v1341_v1  ;;  %v1286_v7 = vmul.f32 %v1283_v31, %v3290_v44  ;;  %v1319_v40 = vrot.slane %v2977_v32, %v2753_v17  ;;  %v1337_v29 = vrot.slane %v2977_v32, %v2756_v37 }
 0x2f4   : > { %v1271_v57 = vadd.f32 %v1268_v60, %v1253_v3  ;;  %v1324_v58 = vadd.f32 %v1321_v47, %v1306_v19  ;;  %v1304_v39 = vmul.f32 %v1301_v13, %v3292_v21  ;;  %2159 = vrcp.f32 %v1445_v54 }
 0x2f5   : > { %v1377_v46 = vadd.f32 %v1374_v56, %v1359_v20  ;;  %v3308_v23 = vrot.slane %v2956_v18, 1  ;;  %v1432_v36 = vadd.f32 %v2999_v14, %v2995_v41  ;;  %v1643_v48 = vsub.f32 %v3309_v28, %v2965_v55 }
 0x2f6   : > { %v1289_v16 = vadd.f32 %v1286_v7, %v1271_v57  ;;  %v1342_v49 = vadd.f32 %v1339_v51, %v1324_v58  ;;  %v1355_v56 = vrot.slane %v2977_v32, %v2759_v61  ;;  %v1646_v31 = vsub.f32 %v3310_v26, %v2965_v55 }
 0x2f7   : > { %v1431_v1 = vadd.f32 %v3308_v23, %v2956_v18  ;;  %v1380_v9 = vmul.f32 8.0, %v1377_v46  ;;  %v1322_v13 = vmul.f32 %v1319_v40, %v3293_v52  ;;  %v1433_v47 = vrot.slane %v1432_v36, 4 }
 0x2f8   : > { %v1307_v54 = vadd.f32 %v1304_v39, %v1289_v16  ;;  %v1651_v3 = vmul.f32 1.442695, %v1643_v48  ;;  %v1360_v18 = vadd.f32 %v1357_v42, %v1342_v49  ;;  %v1373_v60 = vrot.slane %v2980_v8, %v2706_v38 }
 0x2f9   : > { %1383 = vst [vmem:[%s2874_s11 + $0x18] sm:$0xff] %v1380_v9  ;;  %2161 = vrcp.f32 %v1431_v1  ;;  %v1657_v20 = vmul.f32 1.442695, %v1646_v31  ;;  %v1340_v19 = vmul.f32 %v1337_v29, %v3294_v45  ;;  %v1434_v32 = vadd.f32 %v1433_v47, %v1432_v36 }
 0x2fa   : > { %v1325_v51 = vadd.f32 %v1322_v13, %v1307_v54  ;;  %2163 = vpow2.f32 %v1651_v3  ;;  %v1378_v57 = vadd.f32 %v1375_v27, %v1360_v18  ;;  %v1358_v7 = vmul.f32 %v1355_v56, %v3295_v35  ;;  %v3311_v18 = vld [vmem:[#allocation35_spill] sm:$0xff] }
 0x2fb   : > { %2165 = vpow2.f32 %v1657_v20  ;;  %v1435_v46 = vrot.slane %v1434_v32, 2  ;;  %v1376_v58 = vmul.f32 %v1373_v60, %v3297_v5 }
 0x2fc   : > { %v1343_v55 = vadd.f32 %v1340_v19, %v1325_v51  ;;  %v1381_v40 = vmul.f32 8.0, %v1378_v57 }
 0x2fd   : > { %v1436_v23 = vadd.f32 %v1435_v46, %v1434_v32 }
 0x2fe   : > { %v1361_v42 = vadd.f32 %v1358_v7, %v1343_v55  ;;  %v2160_v8 = vpop.eup %2159  ;;  %1384 = vst [vmem:[%s2874_s11 + $0x20] sm:$0xff] %v1381_v40 }
 0x2ff   : > { %v1451_v16 = vmul.f32 %v2160_v8, %v2777_v33  ;;  %v1454_v29 = vmul.f32 %v2160_v8, %v2803_v0  ;;  %v1437_v31 = vrot.slane %v1436_v23, 1 }
 0x300   : > { %v1379_v39 = vadd.f32 %v1376_v58, %v1361_v42 }
 0x301   : > { %v1466_v27 = vrot.slane %v1451_v16, %v2706_v38  ;;  %v1481_v36 = vrot.slane %v1451_v16, %v2709_v24  ;;  %v1499_v28 = vrot.slane %v1451_v16, %v2718_v4  ;;  %v1517_v33 = vrot.slane %v1451_v16, %v2729_v10 }
 0x302   : > { %v1382_v1 = vmul.f32 8.0, %v1379_v39  ;;  %v1535_v0 = vrot.slane %v1451_v16, %v2750_v63  ;;  %v1553_v3 = vrot.slane %v1451_v16, %v2753_v17  ;;  %v1571_v7 = vrot.slane %v1451_v16, %v2756_v37 }
 0x303   : > { %v2162_v48 = vpop.eup %2161  ;;  %v1469_v49 = vmul.f32 %v2908_v30, %v1466_v27  ;;  %v1484_v56 = vmul.f32 %v1481_v36, %v3288_v2  ;;  %v1502_v13 = vmul.f32 %v1499_v28, %v3289_v12  ;;  %v1520_v19 = vmul.f32 %v1517_v33, %v3290_v44  ;;  %v3312_v28 = vld [vmem:[#allocation10_spill] sm:$0xff] }
 0x304   : > { %v3053_v9 = vpop.eup %2163  ;;  %1385 = vst [vmem:[%s2874_s11 + $0x28] sm:$0xff] %v1382_v1  ;;  %v1449_v47 = vmul.f32 %v2162_v48, %v2811_v50  ;;  %v1452_v60 = vmul.f32 %v2162_v48, %v3311_v18  ;;  %v1538_v55 = vmul.f32 %v1535_v0, %v3292_v21  ;;  %v1438_v40 = vadd.f32 %v1437_v31, %v1436_v23  ;;  %v3313_v0 = vld [vmem:[#allocation11_spill] sm:$0xff] }
 0x305   : > { %v3059_v26 = vpop.eup %2165  ;;  %v1487_v54 = vadd.f32 %v1484_v56, %v1469_v49  ;;  %v1556_v39 = vmul.f32 %v1553_v3, %v3293_v52  ;;  %v1589_v1 = vrot.slane %v1451_v16, %v2759_v61  ;;  %v1574_v56 = vmul.f32 %v1571_v7, %v3294_v45 }
 0x306   : > { %v1673_v20 = vadd.f32 %v3059_v26, %v3053_v9  ;;  %v1458_v32 = vrot.slane %v1449_v47, %v2706_v38  ;;  %v1473_v57 = vrot.slane %v1449_v47, %v2709_v24  ;;  %v1491_v50 = vrot.slane %v1449_v47, %v2718_v4 }
 0x307   : > { %v1505_v51 = vadd.f32 %v1502_v13, %v1487_v54  ;;  %v1509_v8 = vrot.slane %v1449_v47, %v2729_v10  ;;  %v1527_v49 = vrot.slane %v1449_v47, %v2750_v63  ;;  %v1607_v23 = vrot.slane %v1454_v29, %v2706_v38 }
 0x308   : > { %v1467_v42 = vmul.f32 %v2806_v62, %v1458_v32  ;;  %v1482_v58 = vmul.f32 %v1473_v57, %v3299_v34  ;;  %v1500_v48 = vmul.f32 %v1491_v50, %v3312_v28  ;;  %2167 = vrcp.f32 %v1438_v40  ;;  %v3315_v50 = vld [vmem:[#allocation15_spill] sm:$0xff] }
 0x309   : > { %v1523_v46 = vadd.f32 %v1520_v19, %v1505_v51  ;;  %v1674_v62 = vrot.slane %v1673_v20, 4  ;;  %v1518_v31 = vmul.f32 %v1509_v8, %v3313_v0  ;;  %v1545_v54 = vrot.slane %v1449_v47, %v2753_v17  ;;  %v3314_v51 = vld [vmem:[#allocation14_spill] sm:$0xff] }
 0x30a   : > { %v1485_v36 = vadd.f32 %v1482_v58, %v1467_v42  ;;  %v1592_v16 = vmul.f32 %v1589_v1, %v3295_v35  ;;  %v1536_v19 = vmul.f32 %v1527_v49, %v3314_v51  ;;  %v1563_v32 = vrot.slane %v1449_v47, %v2756_v37 }
 0x30b   : > { %v1541_v27 = vadd.f32 %v1538_v55, %v1523_v46  ;;  %v1675_v13 = vadd.f32 %v1674_v62, %v1673_v20  ;;  %v1610_v57 = vmul.f32 %v1607_v23, %v3297_v5  ;;  %v1554_v40 = vmul.f32 %v1545_v54, %v3315_v50  ;;  %v3316_v20 = vld [vmem:[#allocation19_spill] sm:$0xff] }
 0x30c   : > { %v1503_v34 = vadd.f32 %v1500_v48, %v1485_v36  ;;  %v1581_v46 = vrot.slane %v1449_v47, %v2759_v61  ;;  %v1599_v1 = vrot.slane %v1452_v60, %v2706_v38 }
 0x30d   : > { %v1559_v33 = vadd.f32 %v1556_v39, %v1541_v27  ;;  %v1676_v29 = vrot.slane %v1675_v13, 2  ;;  %v1572_v39 = vmul.f32 %v1563_v32, %v3316_v20 }
 0x30e   : > { %v1521_v18 = vadd.f32 %v1518_v31, %v1503_v34  ;;  %v1590_v48 = vmul.f32 %v1581_v46, %v3307_v25  ;;  %v1608_v62 = vmul.f32 %v1599_v1, %v2477_v11 }
 0x30f   : > { %v1577_v3 = vadd.f32 %v1574_v56, %v1559_v33  ;;  %v1677_v42 = vadd.f32 %v1676_v29, %v1675_v13 }
 0x310   : > { %v1539_v7 = vadd.f32 %v1536_v19, %v1521_v18  ;;  %v3319_v19 = vld [vmem:[#allocation9_spill] sm:$0xff] }
 0x311   : > { %v1595_v55 = vadd.f32 %v1592_v16, %v1577_v3  ;;  %v1678_v27 = vrot.slane %v1677_v42, 1  ;;  %v3317_v16 = vld [vmem:[#allocation7_spill] sm:$0xff] }
 0x312   : > { %v1557_v8 = vadd.f32 %v1554_v40, %v1539_v7  ;;  %v2168_v49 = vpop.eup %2167 }
 0x313   : > { %v1613_v58 = vadd.f32 %v1610_v57, %v1595_v55  ;;  %v1679_v56 = vadd.f32 %v1678_v27, %v1677_v42  ;;  %v1450_v47 = vmul.f32 %v2168_v49, %v2995_v41  ;;  %v1453_v33 = vmul.f32 %v2168_v49, %v2999_v14  ;;  %v3318_v41 = vld [vmem:[#allocation8_spill] sm:$0xff] }
 0x314   : > { %v1575_v28 = vadd.f32 %v1572_v39, %v1557_v8 }
 0x315   : > { %v1616_v36 = vmul.f32 8.0, %v1613_v58  ;;  %2169 = vrcp.f32 %v1679_v56  ;;  %v1462_v60 = vrot.slane %v1450_v47, %v2706_v38  ;;  %v1477_v0 = vrot.slane %v1450_v47, %v2709_v24 }
 0x316   : > { %v1593_v23 = vadd.f32 %v1590_v48, %v1575_v28  ;;  %v1495_v31 = vrot.slane %v1450_v47, %v2718_v4  ;;  %v1513_v3 = vrot.slane %v1450_v47, %v2729_v10  ;;  %v1531_v14 = vrot.slane %v1450_v47, %v2750_v63 }
 0x317   : > { %1619 = vst [vmem:[%s2874_s11 + $0x40] sm:$0xff] %v1616_v36  ;;  %v1468_v54 = vmul.f32 %v3306_v22, %v1462_v60  ;;  %v1483_v13 = vmul.f32 %v1477_v0, %v3317_v16  ;;  %v1549_v57 = vrot.slane %v1450_v47, %v2753_v17  ;;  %v1567_v29 = vrot.slane %v1450_v47, %v2756_v37 }
 0x318   : > { %v1611_v34 = vadd.f32 %v1608_v62, %v1593_v23  ;;  %v1501_v18 = vmul.f32 %v1495_v31, %v3318_v41  ;;  %v1519_v32 = vmul.f32 %v1513_v3, %v3319_v19  ;;  %v1537_v22 = vmul.f32 %v1531_v14, %v3283_v59 }
 0x319   : > { %v1486_v11 = vadd.f32 %v1483_v13, %v1468_v54  ;;  %v1585_v50 = vrot.slane %v1450_v47, %v2759_v61  ;;  %v1555_v46 = vmul.f32 %v1549_v57, %v3284_v15  ;;  %v1573_v8 = vmul.f32 %v1567_v29, %v3285_v6 }
 0x31a   : > { %v1614_v25 = vmul.f32 8.0, %v1611_v34  ;;  %v1603_v20 = vrot.slane %v1453_v33, %v2706_v38 }
 0x31b   : > { %v1504_v51 = vadd.f32 %v1501_v18, %v1486_v11  ;;  %v1591_v36 = vmul.f32 %v1585_v50, %v3286_v53 }
 0x31c   : > { %1617 = vst [vmem:[%s2874_s11 + $0x30] sm:$0xff] %v1614_v25  ;;  %v1609_v6 = vmul.f32 %v1603_v20, %v3287_v43 }
 0x31d   : > { %v1522_v55 = vadd.f32 %v1519_v32, %v1504_v51 }
 0x31f   : > { %v2170_v7 = vpop.eup %2169  ;;  %v1540_v40 = vadd.f32 %v1537_v22, %v1522_v55 }
 0x320   : > { %v1685_v42 = vmul.f32 %v2170_v7, %v3053_v9  ;;  %v1688_v58 = vmul.f32 %v2170_v7, %v3059_v26 }
 0x321   : > { %v1558_v39 = vadd.f32 %v1555_v46, %v1540_v40 }
 0x322   : > { %v1700_v1 = vrot.slane %v1685_v42, %v2706_v38  ;;  %v1715_v27 = vrot.slane %v1685_v42, %v2709_v24  ;;  %v1733_v59 = vrot.slane %v1685_v42, %v2718_v4  ;;  %v1751_v26 = vrot.slane %v1685_v42, %v2729_v10 }
 0x323   : > { %v1576_v28 = vadd.f32 %v1573_v8, %v1558_v39  ;;  %v1769_v24 = vrot.slane %v1685_v42, %v2750_v63  ;;  %v1787_v62 = vrot.slane %v1685_v42, %v2753_v17  ;;  %v1805_v43 = vrot.slane %v1685_v42, %v2756_v37 }
 0x324   : > { %v1703_v15 = vmul.f32 %v2908_v30, %v1700_v1  ;;  %v1718_v9 = vmul.f32 %v1715_v27, %v3288_v2  ;;  %v1736_v56 = vmul.f32 %v1733_v59, %v3289_v12  ;;  %v1754_v53 = vmul.f32 %v1751_v26, %v3290_v44 }
 0x325   : > { %v1594_v48 = vadd.f32 %v1591_v36, %v1576_v28  ;;  %v1772_v10 = vmul.f32 %v1769_v24, %v3292_v21  ;;  %v1790_v12 = vmul.f32 %v1787_v62, %v3293_v52  ;;  %v1823_v63 = vrot.slane %v1685_v42, %v2759_v61 }
 0x326   : > { %v1721_v49 = vadd.f32 %v1718_v9, %v1703_v15  ;;  %v1808_v44 = vmul.f32 %v1805_v43, %v3294_v45  ;;  %v1841_v17 = vrot.slane %v1688_v58, %v2706_v38 }
 0x327   : > { %v1612_v23 = vadd.f32 %v1609_v6, %v1594_v48  ;;  %v1826_v60 = vmul.f32 %v1823_v63, %v3295_v35 }
 0x328   : > { %v1739_v4 = vadd.f32 %v1736_v56, %v1721_v49  ;;  %v1844_v37 = vmul.f32 %v1841_v17, %v3297_v5 }
 0x329   : > { %v1615_v30 = vmul.f32 8.0, %v1612_v23 }
 0x32a   : > { %v1757_v2 = vadd.f32 %v1754_v53, %v1739_v4 }
 0x32b   : > { %1618 = vst [vmem:[%s2874_s11 + $0x38] sm:$0xff] %v1615_v30 }
 0x32c   : > { %v1775_v47 = vadd.f32 %v1772_v10, %v1757_v2 }
 0x32e   : > { %v1793_v33 = vadd.f32 %v1790_v12, %v1775_v47 }
 0x330   : > { %v1811_v34 = vadd.f32 %v1808_v44, %v1793_v33 }
 0x332   : > { %v1829_v21 = vadd.f32 %v1826_v60, %v1811_v34 }
 0x334   : > { %v1847_v0 = vadd.f32 %v1844_v37, %v1829_v21 }
 0x336   : > { %v1850_v61 = vmul.f32 8.0, %v1847_v0 }
 0x338   : > { %1853 = vst [vmem:[%s2874_s11 + $0x58] sm:$0xff] %v1850_v61 }
 0x339   : > { %2187 = shalt.err (!%p2184_p3)
}
 0x33a   : > { %s2188_s26 = scalar_lea.hbm %s3145_s15, 1536  ;;  %s2192_s7 = scalar_lea.hbm %s3196_s5, 3072 }
 0x33b   : > { %p2189_p4 = scmp.ne.s32.totalorder %s3145_s15, %s2188_s26  ;;  %p2193_p9 = scmp.lt.u32.totalorder %s3145_s15, %s3196_s5 }
 0x33c   : > { %p2194_p10 = scmp.lt.u32.totalorder %s2192_s7, %s2188_s26  ;;  %p2196_p12 = scmp.lt.u32.totalorder %s2188_s26, %s3145_s15 }
 0x33d   : > { %p2190_p7 = pnand %p2189_p4, %p2321_p5 }
 0x33e   : > { %p2195_p11 = por %p2194_p10, %p2193_p9 }
 0x33f   : > { %p2191_p8 = pneg %p2190_p7 }
 0x340   : > { %p2197_p13 = por %p2196_p12, %p2195_p11 }
 0x342   : > { %p2198_p0 = pnand %p2197_p13, %p2191_p8 }
 0x344   : > { %2201 = shalt.err (!%p2198_p0)
}
 0x345   : > { %s2251_s11 = smov 384   ;;  %s2252_s9 = smov 24  }
 0x346   : > { %2044 = dma.vmem_to_hbm [thread:$0]  (%p2321_p5), %s3140_s12, 1536, %s3145_s15, %s3150_s16, %s2251_s11, %s2251_s11, %s2252_s9  }
 0x347 PF: > { %p2050_p1 = scmp.ge.s32.totalorder %s2236_s21, 2  ;;  %s1883_s13 = sand.u32 1, %s2224_s18  }
 0x348   : > { %s1884_s14 = scalar_lea.sflag [#allocation4], %s1883_s13 }
 0x349   : > { %p2047_p2 = pnand %p2050_p1, %p2325_p6 }
 0x34b   : > { %2219 = dma.done.wait (!%p2047_p2), %s1884_s14, 1536  }
 0x34c   : > { %2221 = vsyncadd (!%p2047_p2), %s1884_s14, 4294965760  ;;  %p15_p3 = scmp.ge.s32.totalorder %s2308_s24, 4   ;;  %s3320_s18 = smov %s2228_s19 }
 0x34d   : > { %s3321_s19 = smov %s2232_s20  ;;  %s3322_s20 = smov %s2319_s27 }
 0x34e   : > { %s3323_s21 = smov %s2308_s24  ;;  %17 = sbr.rel (!%p15_p3) target bundleno = 3 (0x3), region = 75 }
 0x355   :  { %1889 = vsyncpa [#allocation4], 1 }
 0x356   :  { %1891 = vsyncpa [#allocation4 + $0x1], 1 }

</bundles_post_ra>
